<compile_context>
chip_gen: v7x
topology: tpu7x:2x2x1
jax: 0.10.0
libtpu: 0.0.40
codegen_flags: <defaults>
</compile_context>

<pallas_src>
import jax
import jax.numpy as jnp
from jax.experimental import pallas as pl
from jax.experimental.pallas import tpu as pltpu

EPS = 1e-5


def resnet_block_kernel(x_ref, w1_ref, g1_ref, b1_ref, w2_ref, g2_ref, b2_ref,
                        o_ref, pad_ref):
    N, H, W, C = x_ref.shape
    M = N * H * W
    inv_m = 1.0 / M

    # Zero the padded scratch ONCE: the interior is fully overwritten before each
    # conv and the 1-pixel halo border stays zero for both convs.
    pad_ref[...] = jnp.zeros_like(pad_ref)

    def conv3x3(w_ref):
        # im2col once per conv: gather the 9 taps into a single (M, 9*C) slab and
        # run one K=9*C MXU matmul (bf16 operands, f32 accumulation).
        taps = [pad_ref[:, dh:dh + H, dw:dw + W, :].reshape(M, C)
                for dh in range(3) for dw in range(3)]
        patches = jnp.concatenate(taps, axis=1).astype(jnp.bfloat16)   # (M, 9C)
        return jnp.dot(patches, w_ref[...], preferred_element_type=jnp.float32)

    def bn(y, g_ref, b_ref):
        # One-pass batch statistics (training-mode BatchNorm2d), f32 accumulation:
        # var = E[y^2] - mean^2 (biased).
        s = jnp.sum(y, axis=0, keepdims=True)
        ss = jnp.sum(y * y, axis=0, keepdims=True)
        mean = s * inv_m
        var = ss * inv_m - mean * mean
        scale = jax.lax.rsqrt(var + EPS) * g_ref[...]
        return (y - mean) * scale + b_ref[...]

    # conv1 -> bn1 -> relu
    pad_ref[:, 1:H + 1, 1:W + 1, :] = x_ref[...]
    y = jnp.maximum(bn(conv3x3(w1_ref), g1_ref, b1_ref), 0.0)

    # conv2 -> bn2: stash relu(bn1) back into the scratch interior so it is not
    # carried as a live value across the second conv.
    pad_ref[:, 1:H + 1, 1:W + 1, :] = y.reshape(N, H, W, C)
    y = bn(conv3x3(w2_ref), g2_ref, b2_ref)

    # Residual add (x re-read only here, keeping its live range short) + relu.
    out = jnp.maximum(y + x_ref[...].reshape(M, C), 0.0)
    o_ref[...] = out.reshape(N, H, W, C).astype(o_ref.dtype)


def resnet_block(x_nchw, w1_oihw, g1, b1, w2_oihw, g2, b2):
    """x_nchw: (N, C, H, W) float32, PyTorch layout. Returns NCHW output."""
    x = jnp.transpose(x_nchw, (0, 2, 3, 1))          # -> NHWC
    N, H, W, C = x.shape

    def prep_w(w_oihw):
        # OIHW -> HWIO -> (9*Cin, Cout) matching the im2col tap order (dh, dw, cin);
        # bf16 MXU operands (accumulation stays f32 in-kernel).
        return jnp.transpose(w_oihw, (2, 3, 1, 0)).reshape(9 * C, C).astype(jnp.bfloat16)

    # TODO(synk): no parallel grid axis (v7x 2nd TensorCore) — training-mode BN
    # needs global (N,H,W) batch statistics, which couples all pixels; a two-phase
    # stats kernel would be required to shard this block across cores.
    out_nhwc = pl.pallas_call(
        resnet_block_kernel,
        out_shape=jax.ShapeDtypeStruct((N, H, W, C), x.dtype),
        in_specs=[pl.BlockSpec(memory_space=pltpu.MemorySpace.VMEM)] * 7,
        out_specs=pl.BlockSpec(memory_space=pltpu.MemorySpace.VMEM),
        scratch_shapes=[pltpu.VMEM((N, H + 2, W + 2, C), jnp.float32)],
        compiler_params=pltpu.CompilerParams(vmem_limit_bytes=32 * 1024 * 1024),
    )(x, prep_w(w1_oihw), g1.reshape(1, C), b1.reshape(1, C),
      prep_w(w2_oihw), g2.reshape(1, C), b2.reshape(1, C))
    return jnp.transpose(out_nhwc, (0, 3, 1, 2))     # -> NCHW


def _reference(x_nchw, w1, g1, b1, w2, g2, b2):
    """Pure-JAX f32 reference mirroring the PyTorch forward (training-mode BN)."""
    def conv(x, w):
        return jax.lax.conv_general_dilated(
            x, w, window_strides=(1, 1), padding=((1, 1), (1, 1)),
            dimension_numbers=("NCHW", "OIHW", "NCHW"))

    def bn(y, g, b):
        mean = jnp.mean(y, axis=(0, 2, 3), keepdims=True)
        var = jnp.mean((y - mean) ** 2, axis=(0, 2, 3), keepdims=True)
        return (y - mean) * jax.lax.rsqrt(var + EPS) * g.reshape(1, -1, 1, 1) \
            + b.reshape(1, -1, 1, 1)

    out = jax.nn.relu(bn(conv(x_nchw, w1), g1, b1))
    out = bn(conv(out, w2), g2, b2)
    return jax.nn.relu(out + x_nchw)


if __name__ == "__main__":
    # Small version of the module (channels=256 in the original); C kept
    # lane-aligned at 128.
    N, C, H, W = 2, 128, 8, 8
    key = jax.random.PRNGKey(0)
    kx, kw1, kw2 = jax.random.split(key, 3)

    x = jax.random.normal(kx, (N, C, H, W), jnp.float32)
    fan_in = C * 3 * 3
    std = (2.0 / fan_in) ** 0.5                      # kaiming-normal-style init
    w1 = jax.random.normal(kw1, (C, C, 3, 3), jnp.float32) * std
    w2 = jax.random.normal(kw2, (C, C, 3, 3), jnp.float32) * std
    g1 = jnp.ones((C,), jnp.float32); b1 = jnp.zeros((C,), jnp.float32)
    g2 = jnp.ones((C,), jnp.float32); b2 = jnp.zeros((C,), jnp.float32)

    out = resnet_block(x, w1, g1, b1, w2, g2, b2)
    jax.block_until_ready(out)

    ref = _reference(x, w1, g1, b1, w2, g2, b2)
    assert out.shape == ref.shape == (N, C, H, W)
    # Tolerance widened vs the pure-f32 version: conv operands are bf16 (f32
    # accumulation), giving ~1e-2 worst-case absolute error across the two convs.
    assert jnp.allclose(out, ref, rtol=3e-2, atol=3e-2)

    # TODO(synk): BatchNorm running_mean/running_var updates (training-time side
    # effect) are not materialized; they do not affect the forward output.
    print("KERNEL_OK")
</pallas_src>

<mosaic_0001>
module attributes {stable_mosaic.version = 11 : i64} {
  func.func @resnet_block_kernel(%arg0: memref<2x8x8x128xf32, #tpu.memory_space<vmem>>, %arg1: memref<1152x128xbf16, #tpu.memory_space<vmem>>, %arg2: memref<1x128xf32, #tpu.memory_space<vmem>>, %arg3: memref<1x128xf32, #tpu.memory_space<vmem>>, %arg4: memref<1152x128xbf16, #tpu.memory_space<vmem>>, %arg5: memref<1x128xf32, #tpu.memory_space<vmem>>, %arg6: memref<1x128xf32, #tpu.memory_space<vmem>>, %arg7: memref<2x8x8x128xf32, #tpu.memory_space<vmem>>, %arg8: memref<2x10x10x128xf32, #tpu.memory_space<vmem>>) attributes {dimension_semantics = [], scalar_prefetch = 0 : i64, scratch_operands = 1 : i64, tpu.core_type = #tpu.core_type<tc>} {
    %cst = arith.constant 0.000000e+00 : f32
    %0 = vector.broadcast %cst : f32 to vector<2x10x10x128xf32>
    %c0 = arith.constant 0 : index
    %c0_0 = arith.constant 0 : index
    %c0_1 = arith.constant 0 : index
    %c0_2 = arith.constant 0 : index
    %1 = vector.load %arg8[%c0, %c0_0, %c0_1, %c0_2] : memref<2x10x10x128xf32, #tpu.memory_space<vmem>>, vector<2x10x10x128xf32>
    tpu.vector_store %arg8[%c0, %c0_0, %c0_1, %c0_2], %0 {strides = array<i32>} : memref<2x10x10x128xf32, #tpu.memory_space<vmem>>, vector<2x10x10x128xf32>,
    %c0_3 = arith.constant 0 : index
    %c0_4 = arith.constant 0 : index
    %c0_5 = arith.constant 0 : index
    %c0_6 = arith.constant 0 : index
    %2 = vector.load %arg0[%c0_3, %c0_4, %c0_5, %c0_6] : memref<2x8x8x128xf32, #tpu.memory_space<vmem>>, vector<2x8x8x128xf32>
    %c0_7 = arith.constant 0 : index
    %c1 = arith.constant 1 : index
    %c1_8 = arith.constant 1 : index
    %c0_9 = arith.constant 0 : index
    %3 = vector.load %arg8[%c0_7, %c1, %c1_8, %c0_9] : memref<2x10x10x128xf32, #tpu.memory_space<vmem>>, vector<2x8x8x128xf32>
    tpu.vector_store %arg8[%c0_7, %c1, %c1_8, %c0_9], %2 {strides = array<i32>} : memref<2x10x10x128xf32, #tpu.memory_space<vmem>>, vector<2x8x8x128xf32>,
    %c0_10 = arith.constant 0 : index
    %c0_11 = arith.constant 0 : index
    %c0_12 = arith.constant 0 : index
    %c0_13 = arith.constant 0 : index
    %4 = vector.load %arg8[%c0_10, %c0_11, %c0_12, %c0_13] : memref<2x10x10x128xf32, #tpu.memory_space<vmem>>, vector<2x8x8x128xf32>
    %5 = vector.shape_cast %4 : vector<2x8x8x128xf32> to vector<128x128xf32>
    %c0_14 = arith.constant 0 : index
    %c0_15 = arith.constant 0 : index
    %c1_16 = arith.constant 1 : index
    %c0_17 = arith.constant 0 : index
    %6 = vector.load %arg8[%c0_14, %c0_15, %c1_16, %c0_17] : memref<2x10x10x128xf32, #tpu.memory_space<vmem>>, vector<2x8x8x128xf32>
    %7 = vector.shape_cast %6 : vector<2x8x8x128xf32> to vector<128x128xf32>
    %c0_18 = arith.constant 0 : index
    %c0_19 = arith.constant 0 : index
    %c2 = arith.constant 2 : index
    %c0_20 = arith.constant 0 : index
    %8 = vector.load %arg8[%c0_18, %c0_19, %c2, %c0_20] : memref<2x10x10x128xf32, #tpu.memory_space<vmem>>, vector<2x8x8x128xf32>
    %9 = vector.shape_cast %8 : vector<2x8x8x128xf32> to vector<128x128xf32>
    %c0_21 = arith.constant 0 : index
    %c1_22 = arith.constant 1 : index
    %c0_23 = arith.constant 0 : index
    %c0_24 = arith.constant 0 : index
    %10 = vector.load %arg8[%c0_21, %c1_22, %c0_23, %c0_24] : memref<2x10x10x128xf32, #tpu.memory_space<vmem>>, vector<2x8x8x128xf32>
    %11 = vector.shape_cast %10 : vector<2x8x8x128xf32> to vector<128x128xf32>
    %c0_25 = arith.constant 0 : index
    %c1_26 = arith.constant 1 : index
    %c1_27 = arith.constant 1 : index
    %c0_28 = arith.constant 0 : index
    %12 = vector.load %arg8[%c0_25, %c1_26, %c1_27, %c0_28] : memref<2x10x10x128xf32, #tpu.memory_space<vmem>>, vector<2x8x8x128xf32>
    %13 = vector.shape_cast %12 : vector<2x8x8x128xf32> to vector<128x128xf32>
    %c0_29 = arith.constant 0 : index
    %c1_30 = arith.constant 1 : index
    %c2_31 = arith.constant 2 : index
    %c0_32 = arith.constant 0 : index
    %14 = vector.load %arg8[%c0_29, %c1_30, %c2_31, %c0_32] : memref<2x10x10x128xf32, #tpu.memory_space<vmem>>, vector<2x8x8x128xf32>
    %15 = vector.shape_cast %14 : vector<2x8x8x128xf32> to vector<128x128xf32>
    %c0_33 = arith.constant 0 : index
    %c2_34 = arith.constant 2 : index
    %c0_35 = arith.constant 0 : index
    %c0_36 = arith.constant 0 : index
    %16 = vector.load %arg8[%c0_33, %c2_34, %c0_35, %c0_36] : memref<2x10x10x128xf32, #tpu.memory_space<vmem>>, vector<2x8x8x128xf32>
    %17 = vector.shape_cast %16 : vector<2x8x8x128xf32> to vector<128x128xf32>
    %c0_37 = arith.constant 0 : index
    %c2_38 = arith.constant 2 : index
    %c1_39 = arith.constant 1 : index
    %c0_40 = arith.constant 0 : index
    %18 = vector.load %arg8[%c0_37, %c2_38, %c1_39, %c0_40] : memref<2x10x10x128xf32, #tpu.memory_space<vmem>>, vector<2x8x8x128xf32>
    %19 = vector.shape_cast %18 : vector<2x8x8x128xf32> to vector<128x128xf32>
    %c0_41 = arith.constant 0 : index
    %c2_42 = arith.constant 2 : index
    %c2_43 = arith.constant 2 : index
    %c0_44 = arith.constant 0 : index
    %20 = vector.load %arg8[%c0_41, %c2_42, %c2_43, %c0_44] : memref<2x10x10x128xf32, #tpu.memory_space<vmem>>, vector<2x8x8x128xf32>
    %21 = vector.shape_cast %20 : vector<2x8x8x128xf32> to vector<128x128xf32>
    %22 = tpu.concatenate %5, %7, %9, %11, %13, %15, %17, %19, %21 in 1 : vector<128x128xf32>, vector<128x128xf32>, vector<128x128xf32>, vector<128x128xf32>, vector<128x128xf32>, vector<128x128xf32>, vector<128x128xf32>, vector<128x128xf32>, vector<128x128xf32> -> vector<128x1152xf32>
    %23 = arith.truncf %22 : vector<128x1152xf32> to vector<128x1152xbf16>
    %c0_45 = arith.constant 0 : index
    %c0_46 = arith.constant 0 : index
    %24 = vector.load %arg1[%c0_45, %c0_46] : memref<1152x128xbf16, #tpu.memory_space<vmem>>, vector<1152x128xbf16>
    %cst_47 = arith.constant dense<0.000000e+00> : vector<128x128xf32>
    %25 = tpu.matmul %23, %24, %cst_47 {dimension_numbers = #tpu.dot_dimension_numbers<[1], [0], [0], [1], [0, 0, 1, 1], [], []>} : vector<128x1152xbf16>, vector<1152x128xbf16>, vector<128x128xf32> -> vector<128x128xf32>
    %cst_48 = arith.constant dense<0.000000e+00> : vector<128xf32>
    %26 = vector.multi_reduction <add>, %25, %cst_48 [0] : vector<128x128xf32> to vector<128xf32>
    %27 = vector.shape_cast %26 : vector<128xf32> to vector<1x128xf32>
    %28 = arith.mulf %25, %25 : vector<128x128xf32>
    %cst_49 = arith.constant dense<0.000000e+00> : vector<128xf32>
    %29 = vector.multi_reduction <add>, %28, %cst_49 [0] : vector<128x128xf32> to vector<128xf32>
    %30 = vector.shape_cast %29 : vector<128xf32> to vector<1x128xf32>
    %cst_50 = arith.constant 7.812500e-03 : f32
    %31 = vector.broadcast %cst_50 : f32 to vector<1x128xf32>
    %32 = arith.mulf %27, %31 : vector<1x128xf32>
    %cst_51 = arith.constant 7.812500e-03 : f32
    %33 = vector.broadcast %cst_51 : f32 to vector<1x128xf32>
    %34 = arith.mulf %30, %33 : vector<1x128xf32>
    %35 = arith.mulf %32, %32 : vector<1x128xf32>
    %36 = arith.subf %34, %35 : vector<1x128xf32>
    %cst_52 = arith.constant 9.99999974E-6 : f32
    %37 = vector.broadcast %cst_52 : f32 to vector<1x128xf32>
    %38 = arith.addf %36, %37 : vector<1x128xf32>
    %39 = math.rsqrt %38 : vector<1x128xf32>
    %c0_53 = arith.constant 0 : index
    %c0_54 = arith.constant 0 : index
    %40 = vector.load %arg2[%c0_53, %c0_54] : memref<1x128xf32, #tpu.memory_space<vmem>>, vector<1x128xf32>
    %41 = arith.mulf %39, %40 : vector<1x128xf32>
    %42 = vector.broadcast %32 : vector<1x128xf32> to vector<128x128xf32>
    %43 = arith.subf %25, %42 : vector<128x128xf32>
    %44 = vector.broadcast %41 : vector<1x128xf32> to vector<128x128xf32>
    %45 = arith.mulf %43, %44 : vector<128x128xf32>
    %c0_55 = arith.constant 0 : index
    %c0_56 = arith.constant 0 : index
    %46 = vector.load %arg3[%c0_55, %c0_56] : memref<1x128xf32, #tpu.memory_space<vmem>>, vector<1x128xf32>
    %47 = vector.broadcast %46 : vector<1x128xf32> to vector<128x128xf32>
    %48 = arith.addf %45, %47 : vector<128x128xf32>
    %cst_57 = arith.constant 0.000000e+00 : f32
    %49 = vector.broadcast %cst_57 : f32 to vector<128x128xf32>
    %50 = arith.maximumf %48, %49 : vector<128x128xf32>
    %51 = vector.shape_cast %50 : vector<128x128xf32> to vector<2x8x8x128xf32>
    %c0_58 = arith.constant 0 : index
    %c1_59 = arith.constant 1 : index
    %c1_60 = arith.constant 1 : index
    %c0_61 = arith.constant 0 : index
    %52 = vector.load %arg8[%c0_58, %c1_59, %c1_60, %c0_61] : memref<2x10x10x128xf32, #tpu.memory_space<vmem>>, vector<2x8x8x128xf32>
    tpu.vector_store %arg8[%c0_58, %c1_59, %c1_60, %c0_61], %51 {strides = array<i32>} : memref<2x10x10x128xf32, #tpu.memory_space<vmem>>, vector<2x8x8x128xf32>,
    %c0_62 = arith.constant 0 : index
    %c0_63 = arith.constant 0 : index
    %c0_64 = arith.constant 0 : index
    %c0_65 = arith.constant 0 : index
    %53 = vector.load %arg8[%c0_62, %c0_63, %c0_64, %c0_65] : memref<2x10x10x128xf32, #tpu.memory_space<vmem>>, vector<2x8x8x128xf32>
    %54 = vector.shape_cast %53 : vector<2x8x8x128xf32> to vector<128x128xf32>
    %c0_66 = arith.constant 0 : index
    %c0_67 = arith.constant 0 : index
    %c1_68 = arith.constant 1 : index
    %c0_69 = arith.constant 0 : index
    %55 = vector.load %arg8[%c0_66, %c0_67, %c1_68, %c0_69] : memref<2x10x10x128xf32, #tpu.memory_space<vmem>>, vector<2x8x8x128xf32>
    %56 = vector.shape_cast %55 : vector<2x8x8x128xf32> to vector<128x128xf32>
    %c0_70 = arith.constant 0 : index
    %c0_71 = arith.constant 0 : index
    %c2_72 = arith.constant 2 : index
    %c0_73 = arith.constant 0 : index
    %57 = vector.load %arg8[%c0_70, %c0_71, %c2_72, %c0_73] : memref<2x10x10x128xf32, #tpu.memory_space<vmem>>, vector<2x8x8x128xf32>
    %58 = vector.shape_cast %57 : vector<2x8x8x128xf32> to vector<128x128xf32>
    %c0_74 = arith.constant 0 : index
    %c1_75 = arith.constant 1 : index
    %c0_76 = arith.constant 0 : index
    %c0_77 = arith.constant 0 : index
    %59 = vector.load %arg8[%c0_74, %c1_75, %c0_76, %c0_77] : memref<2x10x10x128xf32, #tpu.memory_space<vmem>>, vector<2x8x8x128xf32>
    %60 = vector.shape_cast %59 : vector<2x8x8x128xf32> to vector<128x128xf32>
    %c0_78 = arith.constant 0 : index
    %c1_79 = arith.constant 1 : index
    %c1_80 = arith.constant 1 : index
    %c0_81 = arith.constant 0 : index
    %61 = vector.load %arg8[%c0_78, %c1_79, %c1_80, %c0_81] : memref<2x10x10x128xf32, #tpu.memory_space<vmem>>, vector<2x8x8x128xf32>
    %62 = vector.shape_cast %61 : vector<2x8x8x128xf32> to vector<128x128xf32>
    %c0_82 = arith.constant 0 : index
    %c1_83 = arith.constant 1 : index
    %c2_84 = arith.constant 2 : index
    %c0_85 = arith.constant 0 : index
    %63 = vector.load %arg8[%c0_82, %c1_83, %c2_84, %c0_85] : memref<2x10x10x128xf32, #tpu.memory_space<vmem>>, vector<2x8x8x128xf32>
    %64 = vector.shape_cast %63 : vector<2x8x8x128xf32> to vector<128x128xf32>
    %c0_86 = arith.constant 0 : index
    %c2_87 = arith.constant 2 : index
    %c0_88 = arith.constant 0 : index
    %c0_89 = arith.constant 0 : index
    %65 = vector.load %arg8[%c0_86, %c2_87, %c0_88, %c0_89] : memref<2x10x10x128xf32, #tpu.memory_space<vmem>>, vector<2x8x8x128xf32>
    %66 = vector.shape_cast %65 : vector<2x8x8x128xf32> to vector<128x128xf32>
    %c0_90 = arith.constant 0 : index
    %c2_91 = arith.constant 2 : index
    %c1_92 = arith.constant 1 : index
    %c0_93 = arith.constant 0 : index
    %67 = vector.load %arg8[%c0_90, %c2_91, %c1_92, %c0_93] : memref<2x10x10x128xf32, #tpu.memory_space<vmem>>, vector<2x8x8x128xf32>
    %68 = vector.shape_cast %67 : vector<2x8x8x128xf32> to vector<128x128xf32>
    %c0_94 = arith.constant 0 : index
    %c2_95 = arith.constant 2 : index
    %c2_96 = arith.constant 2 : index
    %c0_97 = arith.constant 0 : index
    %69 = vector.load %arg8[%c0_94, %c2_95, %c2_96, %c0_97] : memref<2x10x10x128xf32, #tpu.memory_space<vmem>>, vector<2x8x8x128xf32>
    %70 = vector.shape_cast %69 : vector<2x8x8x128xf32> to vector<128x128xf32>
    %71 = tpu.concatenate %54, %56, %58, %60, %62, %64, %66, %68, %70 in 1 : vector<128x128xf32>, vector<128x128xf32>, vector<128x128xf32>, vector<128x128xf32>, vector<128x128xf32>, vector<128x128xf32>, vector<128x128xf32>, vector<128x128xf32>, vector<128x128xf32> -> vector<128x1152xf32>
    %72 = arith.truncf %71 : vector<128x1152xf32> to vector<128x1152xbf16>
    %c0_98 = arith.constant 0 : index
    %c0_99 = arith.constant 0 : index
    %73 = vector.load %arg4[%c0_98, %c0_99] : memref<1152x128xbf16, #tpu.memory_space<vmem>>, vector<1152x128xbf16>
    %cst_100 = arith.constant dense<0.000000e+00> : vector<128x128xf32>
    %74 = tpu.matmul %72, %73, %cst_100 {dimension_numbers = #tpu.dot_dimension_numbers<[1], [0], [0], [1], [0, 0, 1, 1], [], []>} : vector<128x1152xbf16>, vector<1152x128xbf16>, vector<128x128xf32> -> vector<128x128xf32>
    %cst_101 = arith.constant dense<0.000000e+00> : vector<128xf32>
    %75 = vector.multi_reduction <add>, %74, %cst_101 [0] : vector<128x128xf32> to vector<128xf32>
    %76 = vector.shape_cast %75 : vector<128xf32> to vector<1x128xf32>
    %77 = arith.mulf %74, %74 : vector<128x128xf32>
    %cst_102 = arith.constant dense<0.000000e+00> : vector<128xf32>
    %78 = vector.multi_reduction <add>, %77, %cst_102 [0] : vector<128x128xf32> to vector<128xf32>
    %79 = vector.shape_cast %78 : vector<128xf32> to vector<1x128xf32>
    %cst_103 = arith.constant 7.812500e-03 : f32
    %80 = vector.broadcast %cst_103 : f32 to vector<1x128xf32>
    %81 = arith.mulf %76, %80 : vector<1x128xf32>
    %cst_104 = arith.constant 7.812500e-03 : f32
    %82 = vector.broadcast %cst_104 : f32 to vector<1x128xf32>
    %83 = arith.mulf %79, %82 : vector<1x128xf32>
    %84 = arith.mulf %81, %81 : vector<1x128xf32>
    %85 = arith.subf %83, %84 : vector<1x128xf32>
    %cst_105 = arith.constant 9.99999974E-6 : f32
    %86 = vector.broadcast %cst_105 : f32 to vector<1x128xf32>
    %87 = arith.addf %85, %86 : vector<1x128xf32>
    %88 = math.rsqrt %87 : vector<1x128xf32>
    %c0_106 = arith.constant 0 : index
    %c0_107 = arith.constant 0 : index
    %89 = vector.load %arg5[%c0_106, %c0_107] : memref<1x128xf32, #tpu.memory_space<vmem>>, vector<1x128xf32>
    %90 = arith.mulf %88, %89 : vector<1x128xf32>
    %91 = vector.broadcast %81 : vector<1x128xf32> to vector<128x128xf32>
    %92 = arith.subf %74, %91 : vector<128x128xf32>
    %93 = vector.broadcast %90 : vector<1x128xf32> to vector<128x128xf32>
    %94 = arith.mulf %92, %93 : vector<128x128xf32>
    %c0_108 = arith.constant 0 : index
    %c0_109 = arith.constant 0 : index
    %95 = vector.load %arg6[%c0_108, %c0_109] : memref<1x128xf32, #tpu.memory_space<vmem>>, vector<1x128xf32>
    %96 = vector.broadcast %95 : vector<1x128xf32> to vector<128x128xf32>
    %97 = arith.addf %94, %96 : vector<128x128xf32>
    %c0_110 = arith.constant 0 : index
    %c0_111 = arith.constant 0 : index
    %c0_112 = arith.constant 0 : index
    %c0_113 = arith.constant 0 : index
    %98 = vector.load %arg0[%c0_110, %c0_111, %c0_112, %c0_113] : memref<2x8x8x128xf32, #tpu.memory_space<vmem>>, vector<2x8x8x128xf32>
    %99 = vector.shape_cast %98 : vector<2x8x8x128xf32> to vector<128x128xf32>
    %100 = arith.addf %97, %99 : vector<128x128xf32>
    %cst_114 = arith.constant 0.000000e+00 : f32
    %101 = vector.broadcast %cst_114 : f32 to vector<128x128xf32>
    %102 = arith.maximumf %100, %101 : vector<128x128xf32>
    %103 = vector.shape_cast %102 : vector<128x128xf32> to vector<2x8x8x128xf32>
    %c0_115 = arith.constant 0 : index
    %c0_116 = arith.constant 0 : index
    %c0_117 = arith.constant 0 : index
    %c0_118 = arith.constant 0 : index
    %104 = vector.load %arg7[%c0_115, %c0_116, %c0_117, %c0_118] : memref<2x8x8x128xf32, #tpu.memory_space<vmem>>, vector<2x8x8x128xf32>
    tpu.vector_store %arg7[%c0_115, %c0_116, %c0_117, %c0_118], %103 {strides = array<i32>} : memref<2x8x8x128xf32, #tpu.memory_space<vmem>>, vector<2x8x8x128xf32>,
    return
  }
}

</mosaic_0001>

<bundles_post_ra>
// kernel: tpu_custom_call.1
= control target key start
LH: loop header
LB: loop body
LE: loop exit
PB: predicated region body
PF: predicated region fallthrough
CT: control target
= control target key end

     0   :  { %12 = vsyncpa [#allocation4], 0  ;;  %s5103_s0 = inlined_call_operand.hbm [shape: f32[2,8,8,128], index: 0, kind: input, shape index: {}]   ;;  %s5104_s1 = inlined_call_operand.hbm [shape: bf16[1152,128], index: 1, kind: input, shape index: {}]   ;;  %s5105_s2 = inlined_call_operand.vmem [shape: f32[1,128], index: 2, kind: input, shape index: {}]   ;;  %s5106_s3 = inlined_call_operand.vmem [shape: f32[1,128], index: 3, kind: input, shape index: {}]   ;;  %s5107_s4 = inlined_call_operand.hbm [shape: bf16[1152,128], index: 4, kind: input, shape index: {}]   ;;  %s5108_s5 = inlined_call_operand.vmem [shape: f32[1,128], index: 5, kind: input, shape index: {}]   ;;  %s5109_s6 = inlined_call_operand.vmem [shape: f32[1,128], index: 6, kind: input, shape index: {}]   ;;  %s5110_s7 = inlined_call_operand.hbm [shape: f32[2,8,8,128], index: 7, kind: output, shape index: {}]  }
   0x1   :  { %13 = vsyncpa [#allocation7], 0 }
   0x2   :  { %14 = vsyncpa [#allocation5], 0  ;;  %s4068_s24 = smov [#allocation6]   ;;  %s3974_s28 = scalar_lea.hbm %s5104_s1, 9216 }
   0x3   :  { %s32_s25 = sshll.u32 %s4068_s24, 4  ;;  %p3975_p0 = scmp.ne.s32.totalorder %s5104_s1, %s3974_s28  ;;  %s33_s25 = int_to_ptr.vmem [resolvable:$true] %s32_s25 }
   0x4   :  { %p3978_p1 = scmp.lt.u32.totalorder %s3974_s28, %s5104_s1 }
   0x6   :  { %p3980_p2 = pnand %p3978_p1, %p3975_p0 }
   0x8   :  { %3983 = shalt.err (!%p3980_p2)
}
   0x9   :  { %s3984_s10 = scalar_lea.vmem %s33_s25, 9216  ;;  %p3989_p4 = scmp.lt.s32.totalorder %s33_s25, %s33_s25 }
   0xa   :  { %p3985_p3 = scmp.ne.s32.totalorder %s33_s25, %s3984_s10  ;;  %p3990_p5 = scmp.lt.s32.totalorder %s3984_s10, %s3984_s10 }
   0xc   :  { %p3991_p6 = por %p3990_p5, %p3989_p4 }
   0xe   :  { %p3992_p7 = pnand %p3991_p6, %p3985_p3 }
  0x10   :  { %3995 = shalt.err (!%p3992_p7)
}
  0x11   :  { %s4069_s11 = smov 64   ;;  %s4070_s12 = smov 4  }
  0x12   :  { %38 = dma.hbm_to_vmem [thread:$0]  %s5104_s1, 9216, %s33_s25, [#allocation7], %s4069_s11, %s4069_s11, %s4070_s12  }
  0x13   :  { %s4071_s15 = smov [#allocation3]   ;;  %s3996_s19 = scalar_lea.hbm %s5103_s0, 2048 }
  0x14   :  { %s20_s16 = sshll.u32 %s4071_s15, 4  ;;  %p3997_p8 = scmp.ne.s32.totalorder %s5103_s0, %s3996_s19  ;;  %s21_s16 = int_to_ptr.vmem [resolvable:$true] %s20_s16 }
  0x15   :  { %p4000_p9 = scmp.lt.u32.totalorder %s3996_s19, %s5103_s0 }
  0x17   :  { %p4002_p10 = pnand %p4000_p9, %p3997_p8 }
  0x19   :  { %4005 = shalt.err (!%p4002_p10)
}
  0x1a   :  { %s4006_s24 = scalar_lea.vmem %s21_s16, 2048  ;;  %p4011_p12 = scmp.lt.s32.totalorder %s21_s16, %s21_s16 }
  0x1b   :  { %p4007_p11 = scmp.ne.s32.totalorder %s21_s16, %s4006_s24  ;;  %p4012_p13 = scmp.lt.s32.totalorder %s4006_s24, %s4006_s24 }
  0x1d   :  { %p4013_p0 = por %p4012_p13, %p4011_p12 }
  0x1f   :  { %p4014_p1 = pnand %p4013_p0, %p4007_p11 }
  0x21   :  { %4017 = shalt.err (!%p4014_p1)
}
  0x22   :  { %s4072_s1 = smov 128   ;;  %s4073_s25 = smov 8  }
  0x23   :  { %26 = dma.hbm_to_vmem [thread:$0]  %s5103_s0, 2048, %s21_s16, [#allocation4], %s4072_s1, %s4072_s1, %s4073_s25  }
  0x24   :  { %s4074_s28 = smov [#allocation8]   ;;  %s4018_s9 = scalar_lea.hbm %s5107_s4, 9216 }
  0x25   :  { %s48_s29 = sshll.u32 %s4074_s28, 4  ;;  %p4019_p2 = scmp.ne.s32.totalorder %s5107_s4, %s4018_s9  ;;  %s49_s29 = int_to_ptr.vmem [resolvable:$true] %s48_s29 }
  0x26   :  { %p4022_p3 = scmp.lt.u32.totalorder %s4018_s9, %s5107_s4 }
  0x28   :  { %p4024_p4 = pnand %p4022_p3, %p4019_p2 }
  0x2a   :  { %4027 = shalt.err (!%p4024_p4)
}
  0x2b   :  { %s4028_s17 = scalar_lea.vmem %s49_s29, 9216  ;;  %p4033_p6 = scmp.lt.s32.totalorder %s49_s29, %s49_s29 }
  0x2c   :  { %p4029_p5 = scmp.ne.s32.totalorder %s49_s29, %s4028_s17  ;;  %p4034_p7 = scmp.lt.s32.totalorder %s4028_s17, %s4028_s17 }
  0x2e   :  { %p4035_p8 = por %p4034_p7, %p4033_p6 }
  0x30   :  { %p4036_p9 = pnand %p4035_p8, %p4029_p5 }
  0x32   :  { %4039 = shalt.err (!%p4036_p9)
}
  0x33   :  { %54 = dma.hbm_to_vmem [thread:$0]  %s5107_s4, 9216, %s49_s29, [#allocation7], %s4069_s11, %s4069_s11, %s4070_s12  }
  0x34   :  { %4062 = dma.done.wait [#allocation4], 2048  }
  0x35   :  { %4063 = vsyncadd [#allocation4], 4294965248 }
  0x36   :  { %4064 = dma.done.wait [#allocation7], 18432  }
  0x37   :  { %4065 = vsyncadd [#allocation7], 4294948864  ;;  %v4075_v0 = vmov 0.0   ;;  %v3824_v1 = vld [vmem:[#allocation6 + $0x40] sm:$0xff]   ;;  %v3828_v5 = vld [vmem:[#allocation6 + $0x48] sm:$0xff]  }
  0x38   :  { %69 = vst [vmem:[#allocation2] sm:$0xff] %v4075_v0  ;;  %70 = vst [vmem:[#allocation2 + $0x8] sm:$0x3] %v4075_v0  ;;  %v3825_v2 = vld [vmem:[#allocation6 + $0xc0] sm:$0xff]   ;;  %3207 = vmatprep.subr.bf16.mxu0 %v3824_v1  ;;  %v3829_v6 = vld [vmem:[#allocation6 + $0xc8] sm:$0xff]  }
  0x39   :  { %71 = vst [vmem:[#allocation2 + $0x10] sm:$0xff] %v4075_v0  ;;  %72 = vst [vmem:[#allocation2 + $0x18] sm:$0x3] %v4075_v0  ;;  %v3826_v3 = vld [vmem:[#allocation6] sm:$0xff]   ;;  %3271 = vmatprep.subr.bf16.mxu1 %v3825_v2  ;;  %v3830_v7 = vld [vmem:[#allocation6 + $0x8] sm:$0xff]  }
  0x3a   :  { %73 = vst [vmem:[#allocation2 + $0x20] sm:$0xff] %v4075_v0  ;;  %74 = vst [vmem:[#allocation2 + $0x28] sm:$0x3] %v4075_v0  ;;  %v3827_v4 = vld [vmem:[#allocation6 + $0x80] sm:$0xff]   ;;  %3208 = vmatpush3.bf16.msra.mxu0 %v3826_v3  ;;  %v3831_v8 = vld [vmem:[#allocation6 + $0x88] sm:$0xff]  }
  0x3b   :  { %75 = vst [vmem:[#allocation2 + $0x30] sm:$0xff] %v4075_v0  ;;  %76 = vst [vmem:[#allocation2 + $0x38] sm:$0x3] %v4075_v0  ;;  %3272 = vmatpush3.bf16.msra.mxu1 %v3827_v4  ;;  %3209 = vmatprep.subr.bf16.mxu0 %v3828_v5  ;;  %v3832_v9 = vld [vmem:[#allocation6 + $0x50] sm:$0xff]   ;;  %v3836_v13 = vld [vmem:[#allocation6 + $0x58] sm:$0xff]  }
  0x3c   :  { %77 = vst [vmem:[#allocation2 + $0x40] sm:$0xff] %v4075_v0  ;;  %78 = vst [vmem:[#allocation2 + $0x48] sm:$0x3] %v4075_v0  ;;  %3273 = vmatprep.subr.bf16.mxu1 %v3829_v6  ;;  %v3833_v10 = vld [vmem:[#allocation6 + $0xd0] sm:$0xff]   ;;  %v3837_v14 = vld [vmem:[#allocation6 + $0xd8] sm:$0xff]  }
  0x3d   :  { %79 = vst [vmem:[#allocation2 + $0x50] sm:$0xff] %v4075_v0  ;;  %80 = vst [vmem:[#allocation2 + $0x58] sm:$0x3] %v4075_v0  ;;  %v3834_v11 = vld [vmem:[#allocation6 + $0x10] sm:$0xff]   ;;  %v3838_v15 = vld [vmem:[#allocation6 + $0x18] sm:$0xff]  }
  0x3e   :  { %81 = vst [vmem:[#allocation2 + $0x60] sm:$0xff] %v4075_v0  ;;  %82 = vst [vmem:[#allocation2 + $0x68] sm:$0x3] %v4075_v0  ;;  %3210 = vmatpush3.bf16.msra.mxu0 %v3830_v7  ;;  %v3835_v12 = vld [vmem:[#allocation6 + $0x90] sm:$0xff]   ;;  %v3839_v16 = vld [vmem:[#allocation6 + $0x98] sm:$0xff]  }
  0x3f   :  { %83 = vst [vmem:[#allocation2 + $0x70] sm:$0xff] %v4075_v0  ;;  %84 = vst [vmem:[#allocation2 + $0x78] sm:$0x3] %v4075_v0  ;;  %3274 = vmatpush3.bf16.msra.mxu1 %v3831_v8  ;;  %3211 = vmatprep.subr.bf16.mxu0 %v3832_v9  ;;  %v3840_v17 = vld [vmem:[#allocation6 + $0x60] sm:$0xff]   ;;  %v3844_v21 = vld [vmem:[#allocation6 + $0x68] sm:$0xff]  }
  0x40   :  { %85 = vst [vmem:[#allocation2 + $0x80] sm:$0xff] %v4075_v0  ;;  %86 = vst [vmem:[#allocation2 + $0x88] sm:$0x3] %v4075_v0  ;;  %3275 = vmatprep.subr.bf16.mxu1 %v3833_v10  ;;  %v3841_v18 = vld [vmem:[#allocation6 + $0xe0] sm:$0xff]   ;;  %v3845_v22 = vld [vmem:[#allocation6 + $0xe8] sm:$0xff]  }
  0x41   :  { %87 = vst [vmem:[#allocation2 + $0x90] sm:$0xff] %v4075_v0  ;;  %88 = vst [vmem:[#allocation2 + $0x98] sm:$0x3] %v4075_v0  ;;  %v3842_v19 = vld [vmem:[#allocation6 + $0x20] sm:$0xff]   ;;  %v3846_v23 = vld [vmem:[#allocation6 + $0x28] sm:$0xff]  }
  0x42   :  { %89 = vst [vmem:[#allocation2 + $0xa0] sm:$0xff] %v4075_v0  ;;  %90 = vst [vmem:[#allocation2 + $0xa8] sm:$0x3] %v4075_v0  ;;  %3212 = vmatpush3.bf16.msra.mxu0 %v3834_v11  ;;  %v3843_v20 = vld [vmem:[#allocation6 + $0xa0] sm:$0xff]   ;;  %v3847_v24 = vld [vmem:[#allocation6 + $0xa8] sm:$0xff]  }
  0x43   :  { %91 = vst [vmem:[#allocation2 + $0xb0] sm:$0xff] %v4075_v0  ;;  %92 = vst [vmem:[#allocation2 + $0xb8] sm:$0x3] %v4075_v0  ;;  %3276 = vmatpush3.bf16.msra.mxu1 %v3835_v12  ;;  %3213 = vmatprep.subr.bf16.mxu0 %v3836_v13  ;;  %v3848_v25 = vld [vmem:[#allocation6 + $0x70] sm:$0xff]   ;;  %v3852_v29 = vld [vmem:[#allocation6 + $0x78] sm:$0xff]  }
  0x44   :  { %93 = vst [vmem:[#allocation2 + $0xc0] sm:$0xff] %v4075_v0  ;;  %94 = vst [vmem:[#allocation2 + $0xc8] sm:$0x3] %v4075_v0  ;;  %3277 = vmatprep.subr.bf16.mxu1 %v3837_v14  ;;  %v3849_v26 = vld [vmem:[#allocation6 + $0xf0] sm:$0xff]   ;;  %v3853_v30 = vld [vmem:[#allocation6 + $0xf8] sm:$0xff]  }
  0x45   :  { %95 = vst [vmem:[#allocation2 + $0xd0] sm:$0xff] %v4075_v0  ;;  %96 = vst [vmem:[#allocation2 + $0xd8] sm:$0x3] %v4075_v0  ;;  %v3850_v27 = vld [vmem:[#allocation6 + $0x30] sm:$0xff]   ;;  %v3854_v31 = vld [vmem:[#allocation6 + $0x38] sm:$0xff]  }
  0x46   :  { %97 = vst [vmem:[#allocation2 + $0xe0] sm:$0xff] %v4075_v0  ;;  %98 = vst [vmem:[#allocation2 + $0xe8] sm:$0x3] %v4075_v0  ;;  %3214 = vmatpush3.bf16.msra.mxu0 %v3838_v15  ;;  %v3851_v28 = vld [vmem:[#allocation6 + $0xb0] sm:$0xff]   ;;  %v3855_v32 = vld [vmem:[#allocation6 + $0xb8] sm:$0xff]  }
  0x47   :  { %99 = vst [vmem:[#allocation2 + $0xf0] sm:$0xff] %v4075_v0  ;;  %100 = vst [vmem:[#allocation2 + $0xf8] sm:$0x3] %v4075_v0  ;;  %3278 = vmatpush3.bf16.msra.mxu1 %v3839_v16  ;;  %3215 = vmatprep.subr.bf16.mxu0 %v3840_v17  ;;  %v4202_v33 = vld [vmem:[#allocation3] sm:$0xff]  ;;  %v4204_v35 = vld [vmem:[#allocation3 + $0x8] sm:$0xff] }
  0x48   :  { %101 = vst [vmem:[#allocation2 + $0x100] sm:$0xff] %v4075_v0  ;;  %102 = vst [vmem:[#allocation2 + $0x108] sm:$0x3] %v4075_v0  ;;  %3279 = vmatprep.subr.bf16.mxu1 %v3841_v18  ;;  %v158_v34 = vld [vmem:[#allocation2 + $0x1] sm:$0xff]  ;;  %v291_v37 = vpack.c.bf16 %v4204_v35, %v4202_v33  ;;  %v4211_v39 = vld [vmem:[#allocation3 + $0x10] sm:$0xff] }
  0x49   :  { %103 = vst [vmem:[#allocation2 + $0x110] sm:$0xff] %v4075_v0  ;;  %104 = vst [vmem:[#allocation2 + $0x118] sm:$0x3] %v4075_v0  ;;  %v288_v36 = vpack.c.bf16 %v4202_v33, %v158_v34  ;;  %v3856_v38 = vld [vmem:[#allocation6 + $0x140] sm:$0xff]   ;;  %v4213_v40 = vld [vmem:[#allocation3 + $0x18] sm:$0xff]  ;;  %v4233_v53 = vpack.c.bf16 %v4211_v39, %v4204_v35 }
  0x4a   :  { %105 = vst [vmem:[#allocation2 + $0x120] sm:$0xff] %v4075_v0  ;;  %106 = vst [vmem:[#allocation2 + $0x128] sm:$0x3] %v4075_v0  ;;  %3216 = vmatpush3.bf16.msra.mxu0 %v3842_v19  ;;  %v300_v41 = vpack.c.bf16 %v4213_v40, %v4211_v39  ;;  %v174_v42 = vld [vmem:[#allocation2 + $0x2] sm:$0xff]  ;;  %v4235_v55 = vld [vmem:[#allocation3 + $0x30] sm:$0xff] }
  0x4b   :  { %107 = vst [vmem:[#allocation2 + $0x130] sm:$0xff] %v4075_v0  ;;  %108 = vst [vmem:[#allocation2 + $0x138] sm:$0x3] %v4075_v0  ;;  %3280 = vmatpush3.bf16.msra.mxu1 %v3843_v20  ;;  %3217 = vmatprep.subr.bf16.mxu0 %v3844_v21  ;;  %v4219_v43 = vld [vmem:[#allocation3 + $0x20] sm:$0xff]  ;;  %v4221_v44 = vld [vmem:[#allocation3 + $0x28] sm:$0xff] }
  0x4c   :  { %3281 = vmatprep.subr.bf16.mxu1 %v3845_v22  ;;  %126 = vst [vmem:[#allocation2 + $0x11] sm:$0xff] %v4202_v33  ;;  %127 = vst [vmem:[#allocation2 + $0x21] sm:$0xff] %v4204_v35  ;;  %967 = vmatprep.mubr.bf16.mxu0 %v288_v36  ;;  %v3857_v45 = vld [vmem:[#allocation6 + $0x100] sm:$0xff]   ;;  %v309_v46 = vpack.c.bf16 %v4221_v44, %v4219_v43  ;;  %v3858_v54 = vld [vmem:[#allocation6 + $0x148] sm:$0xff]   ;;  %v4258_v7 = vpack.c.bf16 %v4219_v43, %v4213_v40 }
  0x4d   :  { %128 = vst [vmem:[#allocation2 + $0x31] sm:$0xff] %v4211_v39  ;;  %129 = vst [vmem:[#allocation2 + $0x41] sm:$0xff] %v4213_v40  ;;  %v4237_v56 = vld [vmem:[#allocation3 + $0x38] sm:$0xff]  ;;  %v3859_v59 = vld [vmem:[#allocation6 + $0x108] sm:$0xff]  }
  0x4e   :  { %3218 = vmatpush3.bf16.msra.mxu0 %v3846_v23  ;;  %130 = vst [vmem:[#allocation2 + $0x51] sm:$0xff] %v4219_v43  ;;  %131 = vst [vmem:[#allocation2 + $0x61] sm:$0xff] %v4221_v44  ;;  %v318_v60 = vpack.c.bf16 %v4237_v56, %v4235_v55  ;;  %v3860_v63 = vld [vmem:[#allocation6 + $0x150] sm:$0xff]   ;;  %v4250_v5 = vld [vmem:[#allocation3 + $0x40] sm:$0xff] }
  0x4f   :  { %3282 = vmatpush3.bf16.msra.mxu1 %v3847_v24  ;;  %3219 = vmatprep.subr.bf16.mxu0 %v3848_v25  ;;  %132 = vst [vmem:[#allocation2 + $0x71] sm:$0xff] %v4235_v55  ;;  %133 = vst [vmem:[#allocation2 + $0x81] sm:$0xff] %v4237_v56  ;;  %v4261_v8 = vld [vmem:[#allocation3 + $0x48] sm:$0xff]  ;;  %v3861_v10 = vld [vmem:[#allocation6 + $0x110] sm:$0xff]  }
  0x50   :  { %3283 = vmatprep.subr.bf16.mxu1 %v3849_v26  ;;  %134 = vst [vmem:[#allocation2 + $0xb1] sm:$0xff] %v4250_v5  ;;  %135 = vst [vmem:[#allocation2 + $0xc1] sm:$0xff] %v4261_v8  ;;  %v327_v11 = vpack.c.bf16 %v4261_v8, %v4250_v5  ;;  %v3862_v12 = vld [vmem:[#allocation6 + $0x158] sm:$0xff]   ;;  %v3865_v16 = vld [vmem:[#allocation6 + $0x1c0] sm:$0xff]   ;;  %v4288_v26 = vpack.c.bf16 %v4235_v55, %v4221_v44 }
  0x51   :  { %v3863_v15 = vld [vmem:[#allocation6 + $0x118] sm:$0xff]   ;;  %v3864_v19 = vld [vmem:[#allocation6 + $0x160] sm:$0xff]   ;;  %v3868_v21 = vld [vmem:[#allocation6 + $0x1c8] sm:$0xff]  }
  0x52   :  { %3220 = vmatpush3.bf16.msra.mxu0 %v3850_v27  ;;  %v3867_v20 = vld [vmem:[#allocation6 + $0x180] sm:$0xff]   ;;  %v4275_v22 = vld [vmem:[#allocation3 + $0x50] sm:$0xff]  ;;  %v4280_v24 = vld [vmem:[#allocation3 + $0x58] sm:$0xff] }
  0x53   :  { %3284 = vmatpush3.bf16.msra.mxu1 %v3851_v28  ;;  %3221 = vmatprep.subr.bf16.mxu0 %v3852_v29  ;;  %v190_v47 = vld [vmem:[#allocation2 + $0x10] sm:$0xff]  ;;  %v191_v48 = vld [vmem:[#allocation2 + $0x20] sm:$0xff]  ;;  %136 = vst [vmem:[#allocation2 + $0xd1] sm:$0xff] %v4275_v22  ;;  %137 = vst [vmem:[#allocation2 + $0xe1] sm:$0xff] %v4280_v24  ;;  %v336_v27 = vpack.c.bf16 %v4280_v24, %v4275_v22 }
  0x54   :  { %3285 = vmatprep.subr.bf16.mxu1 %v3853_v30  ;;  %v4227_v49 = vld [vmem:[#allocation2 + $0x12] sm:$0xff]  ;;  %v290_v50 = vpack.c.bf16 %v191_v48, %v190_v47  ;;  %v287_v51 = vpack.c.bf16 %v190_v47, %v4075_v0  ;;  %v193_v58 = vld [vmem:[#allocation2 + $0x40] sm:$0xff]  ;;  %v3869_v30 = vld [vmem:[#allocation6 + $0x188] sm:$0xff]  }
  0x55   :  { %v289_v52 = vpack.c.bf16 %v4227_v49, %v174_v42  ;;  %v192_v57 = vld [vmem:[#allocation2 + $0x30] sm:$0xff]  ;;  %v4243_v62 = vld [vmem:[#allocation2 + $0x22] sm:$0xff] }
  0x56   :  { %3222 = vmatpush3.bf16.msra.mxu0 %v3854_v31  ;;  %1064 = vmatprep.mubr.bf16.mxu1 %v290_v50  ;;  %v299_v61 = vpack.c.bf16 %v193_v58, %v192_v57  ;;  %v4246_v1 = vld [vmem:[#allocation2 + $0x32] sm:$0xff]  ;;  %v195_v3 = vld [vmem:[#allocation2 + $0x60] sm:$0xff]  ;;  %v4248_v4 = vpack.c.bf16 %v192_v57, %v191_v48  ;;  %v3870_v31 = vld [vmem:[#allocation6 + $0x168] sm:$0xff]  }
  0x57   :  { %3286 = vmatpush3.bf16.msra.mxu1 %v3855_v32  ;;  %3335 = vmatprep.subr.bf16.mxu0 %v3856_v38  ;;  %v194_v2 = vld [vmem:[#allocation2 + $0x50] sm:$0xff]  ;;  %v4254_v6 = vpack.c.bf16 %v4246_v1, %v4243_v62  ;;  %v4267_v13 = vld [vmem:[#allocation2 + $0x42] sm:$0xff] }
  0x58   :  { %v308_v9 = vpack.c.bf16 %v195_v3, %v194_v2  ;;  %v4269_v14 = vld [vmem:[#allocation2 + $0x52] sm:$0xff]  ;;  %v4273_v18 = vld [vmem:[#allocation2 + $0x80] sm:$0xff]  ;;  %3399 = vmatprep.subr.bf16.mxu1 %v3865_v16  ;;  %v4277_v23 = vpack.c.bf16 %v194_v2, %v193_v58  ;;  %v3871_v38 = vld [vmem:[#allocation6 + $0x128] sm:$0xff]  }
  0x59   :  { %968 = vmatmul.mubr.bf16.vlgmr.msra.gmra.mrb[0].mxu0 %v287_v51  ;;  %v196_v17 = vld [vmem:[#allocation2 + $0x70] sm:$0xff]  ;;  %v4284_v25 = vpack.c.bf16 %v4269_v14, %v4267_v13  ;;  %v3866_v29 = vld [vmem:[#allocation6 + $0x120] sm:$0xff]   ;;  %v3874_v51 = vld [vmem:[#allocation6 + $0x1d8] sm:$0xff]  }
  0x5a   :  { %1065 = vmatmul.mubr.bf16.vlgmr.msra.gmra.mrb[0].mxu1 %v289_v52  ;;  %3336 = vmatpush3.bf16.msra.mxu0 %v3857_v45  ;;  %v317_v28 = vpack.c.bf16 %v4273_v18, %v196_v17  ;;  %v4295_v32 = vld [vmem:[#allocation2 + $0x62] sm:$0xff]  ;;  %v4297_v34 = vld [vmem:[#allocation2 + $0x72] sm:$0xff]  ;;  %v4301_v50 = vpack.c.bf16 %v196_v17, %v195_v3 }
  0x5b   :  { %975 = vmatprep.mubr.bf16.mxu0 %v4233_v53  ;;  %3337 = vmatprep.subr.bf16.mxu0 %v3858_v54  ;;  %v166_v36 = vld [vmem:[#allocation2 + $0xa1] sm:$0xff]  ;;  %v3872_v42 = vld [vmem:[#allocation6 + $0x1d0] sm:$0xff]   ;;  %v4307_v54 = vpack.c.bf16 %v4297_v34, %v4295_v32 }
  0x5c   :  { %1072 = vmatprep.mubr.bf16.mxu1 %v299_v61  ;;  %3400 = vmatpush3.bf16.msra.mxu1 %v3867_v20  ;;  %v3873_v45 = vld [vmem:[#allocation6 + $0x190] sm:$0xff]   ;;  %v199_v48 = vld [vmem:[#allocation2 + $0xc0] sm:$0xff]  ;;  %v324_v57 = vpack.c.bf16 %v4250_v5, %v166_v36  ;;  %v4311_v58 = vld [vmem:[#allocation3 + $0x68] sm:$0xff] }
  0x5d   :  { %3401 = vmatprep.subr.bf16.mxu1 %v3868_v21  ;;  %v198_v47 = vld [vmem:[#allocation2 + $0xb0] sm:$0xff]  ;;  %v4303_v52 = vld [vmem:[#allocation3 + $0x60] sm:$0xff]  ;;  %139 = vst [vmem:[#allocation2 + $0x101] sm:$0xff] %v4311_v58  ;;  %v3875_v61 = vld [vmem:[#allocation6 + $0x198] sm:$0xff]  }
  0x5e   :  { %3338 = vmatpush3.bf16.msra.mxu0 %v3859_v59  ;;  %138 = vst [vmem:[#allocation2 + $0xf1] sm:$0xff] %v4303_v52  ;;  %v326_v59 = vpack.c.bf16 %v199_v48, %v198_v47  ;;  %v3876_v2 = vld [vmem:[#allocation6 + $0x170] sm:$0xff]   ;;  %v182_v3 = vld [vmem:[#allocation2 + $0xa2] sm:$0xff]  ;;  %v323_v21 = vpack.c.bf16 %v198_v47, %v4075_v0  ;;  %v3882_v0 = vld [vmem:[#allocation6 + $0x178] sm:$0xff]  }
  0x5f   :  { %3339 = vmatprep.subr.bf16.mxu0 %v3860_v63  ;;  %v345_v63 = vpack.c.bf16 %v4311_v58, %v4303_v52  ;;  %v3878_v16 = vld [vmem:[#allocation6 + $0x1e0] sm:$0xff]   ;;  %v4320_v20 = vld [vmem:[#allocation3 + $0x70] sm:$0xff]  ;;  %v3883_v47 = vld [vmem:[#allocation6 + $0x138] sm:$0xff]  }
  0x60   :  { %3402 = vmatpush3.bf16.msra.mxu1 %v3869_v30  ;;  %v3879_v17 = vld [vmem:[#allocation6 + $0x1a0] sm:$0xff]   ;;  %140 = vst [vmem:[#allocation2 + $0x111] sm:$0xff] %v4320_v20  ;;  %v4329_v30 = vpack.c.bf16 %v4275_v22, %v4261_v8  ;;  %v262_v35 = vld [vmem:[#allocation2 + $0x91] sm:$0xff] }
  0x61   :  { %976 = vmatmul.mubr.bf16.gmra.mrb[4].mxu0 %v4248_v4  ;;  %3403 = vmatprep.subr.bf16.mxu1 %v3872_v42  ;;  %v4334_v42 = vld [vmem:[#allocation2 + $0xc2] sm:$0xff]  ;;  %v3894_v39 = vld [vmem:[#allocation6 + $0x230] sm:$0xff]  }
  0x62   :  { %1073 = vmatmul.mubr.bf16.gmra.mrb[4].mxu1 %v4254_v6  ;;  %983 = vmatprep.mubr.bf16.mxu0 %v4258_v7  ;;  %v229_v33 = vld [vmem:[#allocation2 + $0x82] sm:$0xff]  ;;  %v270_v55 = vld [vmem:[#allocation2 + $0x131] sm:$0xff] }
  0x63   :  { %1080 = vmatprep.mubr.bf16.mxu1 %v308_v9  ;;  %3340 = vmatpush3.bf16.msra.mxu0 %v3861_v10  ;;  %v4317_v9 = vld [vmem:[#allocation2 + $0xb2] sm:$0xff]  ;;  %v3972_v40 = vld [vmem:[#allocation2] sm:$0xff] }
  0x64   :  { %3341 = vmatprep.subr.bf16.mxu0 %v3862_v12  ;;  %3404 = vmatpush3.bf16.msra.mxu1 %v3873_v45  ;;  %v3877_v10 = vld [vmem:[#allocation6 + $0x130] sm:$0xff]  }
  0x65   :  { %3405 = vmatprep.subr.bf16.mxu1 %v3874_v51  ;;  %v200_v12 = vld [vmem:[#allocation2 + $0xd0] sm:$0xff] }
  0x66   :  { %v4336_v45 = vld [vmem:[#allocation2 + $0xd2] sm:$0xff] }
  0x67   :  { %3342 = vmatpush3.bf16.msra.mxu0 %v3863_v15  ;;  %v201_v15 = vld [vmem:[#allocation2 + $0xe0] sm:$0xff]  ;;  %v3884_v51 = vld [vmem:[#allocation6 + $0x1f0] sm:$0xff]  }
  0x68   :  { %3343 = vmatprep.subr.bf16.mxu0 %v3864_v19  ;;  %3406 = vmatpush3.bf16.msra.mxu1 %v3875_v61  ;;  %v3880_v19 = vld [vmem:[#allocation6 + $0x1e8] sm:$0xff]   ;;  %v335_v36 = vpack.c.bf16 %v201_v15, %v200_v12  ;;  %v203_v61 = vld [vmem:[#allocation2 + $0x100] sm:$0xff]  ;;  %v278_v8 = vld [vmem:[#allocation2 + $0x92] sm:$0xff] }
  0x69   :  { %984 = vmatmul.mubr.bf16.gmra.mrb[8].mxu0 %v4277_v23  ;;  %3407 = vmatprep.subr.bf16.mxu1 %v3878_v16  ;;  %v4347_v16 = vpack.c.bf16 %v4303_v52, %v4280_v24 }
  0x6a   :  { %1081 = vmatmul.mubr.bf16.gmra.mrb[8].mxu1 %v4284_v25  ;;  %991 = vmatprep.mubr.bf16.mxu0 %v4288_v26 }
  0x6b   :  { %1088 = vmatprep.mubr.bf16.mxu1 %v317_v28  ;;  %3344 = vmatpush3.bf16.msra.mxu0 %v3866_v29  ;;  %v4324_v28 = vld [vmem:[#allocation3 + $0x78] sm:$0xff]  ;;  %v325_v29 = vpack.c.bf16 %v4317_v9, %v182_v3 }
  0x6c   :  { %3345 = vmatprep.subr.bf16.mxu0 %v3870_v31  ;;  %3408 = vmatpush3.bf16.msra.mxu1 %v3879_v17  ;;  %141 = vst [vmem:[#allocation2 + $0x121] sm:$0xff] %v4324_v28  ;;  %v354_v31 = vpack.c.bf16 %v4324_v28, %v4320_v20  ;;  %v3886_v3 = vld [vmem:[#allocation6 + $0x1f8] sm:$0xff]  }
  0x6d   :  { %3409 = vmatprep.subr.bf16.mxu1 %v3880_v19  ;;  %v3887_v17 = vld [vmem:[#allocation6 + $0x1b8] sm:$0xff]  }
  0x6f   :  { %3346 = vmatpush3.bf16.msra.mxu0 %v3871_v38  ;;  %v3881_v38 = vld [vmem:[#allocation6 + $0x1a8] sm:$0xff]  }
  0x70   :  { %3347 = vmatprep.subr.bf16.mxu0 %v3876_v2  ;;  %3410 = vmatpush3.bf16.msra.mxu1 %v3881_v38  ;;  %v4339_v2 = vpack.c.bf16 %v200_v12, %v199_v48  ;;  %v4354_v48 = vld [vmem:[#allocation2 + $0xf2] sm:$0xff] }
  0x71   :  { %992 = vmatmul.mubr.bf16.gmra.mrb[12].mxu0 %v4301_v50  ;;  %3411 = vmatprep.subr.bf16.mxu1 %v3884_v51  ;;  %v204_v12 = vld [vmem:[#allocation2 + $0x110] sm:$0xff] }
  0x72   :  { %1089 = vmatmul.mubr.bf16.gmra.mrb[12].mxu1 %v4307_v54  ;;  %999 = vmatprep.mubr.bf16.mxu0 %v324_v57  ;;  %v3885_v57 = vld [vmem:[#allocation6 + $0x1b0] sm:$0xff]  }
  0x73   :  { %1096 = vmatprep.mubr.bf16.mxu1 %v326_v59  ;;  %3348 = vmatpush3.bf16.msra.mxu0 %v3877_v10  ;;  %v202_v59 = vld [vmem:[#allocation2 + $0xf0] sm:$0xff]  ;;  %v4343_v10 = vpack.c.bf16 %v4336_v45, %v4334_v42 }
  0x74   :  { %3349 = vmatprep.subr.bf16.mxu0 %v3882_v0  ;;  %3412 = vmatpush3.bf16.msra.mxu1 %v3885_v57  ;;  %v344_v19 = vpack.c.bf16 %v203_v61, %v202_v59  ;;  %v4358_v38 = vpack.c.bf16 %v202_v59, %v201_v15  ;;  %v4370_v57 = vld [vmem:[#allocation2 + $0x102] sm:$0xff]  ;;  %v4376_v15 = vpack.c.bf16 %v204_v12, %v203_v61  ;;  %v3890_v61 = vld [vmem:[#allocation6 + $0x210] sm:$0xff]  }
  0x75   :  { %3413 = vmatprep.subr.bf16.mxu1 %v3886_v3  ;;  %v4372_v3 = vld [vmem:[#allocation2 + $0x112] sm:$0xff]  ;;  %v346_v44 = vpack.c.bf16 %v4370_v57, %v4354_v48 }
  0x76   :  { %v4380_v59 = vpack.c.bf16 %v4372_v3, %v4370_v57 }
  0x77   :  { %3350 = vmatpush3.bf16.msra.mxu0 %v3883_v47  ;;  %v4366_v47 = vpack.c.bf16 %v4320_v20, %v4311_v58 }
  0x78   :  { %3414 = vmatpush3.bf16.msra.mxu1 %v3887_v17  ;;  %v292_v17 = vpack.c.bf16 %v4243_v62, %v4227_v49  ;;  %v310_v49 = vpack.c.bf16 %v4295_v32, %v4269_v14  ;;  %v319_v62 = vpack.c.bf16 %v229_v33, %v4297_v34  ;;  %v286_v14 = vld [vmem:[#allocation2 + $0x132] sm:$0xff] }
  0x79   :  { %1000 = vmatmul.mubr.bf16.gmra.mrb[16].mxu0 %v323_v21  ;;  %v3888_v21 = vld [vmem:[#allocation6 + $0x200] sm:$0xff]  }
  0x7a   :  { %1097 = vmatmul.mubr.bf16.gmra.mrb[16].mxu1 %v325_v29  ;;  %1007 = vmatprep.mubr.bf16.mxu0 %v4329_v30  ;;  %v4350_v29 = vld [vmem:[#allocation2 + $0xe2] sm:$0xff] }
  0x7b   :  { %1104 = vmatprep.mubr.bf16.mxu1 %v335_v36  ;;  %3751 = vmatprep.subr.bf16.mxu0 %v3888_v21  ;;  %v4356_v36 = vld [vmem:[#allocation2 + $0x120] sm:$0xff]  ;;  %v4362_v0 = vpack.c.bf16 %v4354_v48, %v4350_v29  ;;  %v337_v43 = vpack.c.bf16 %v4350_v29, %v4336_v45 }
  0x7c   :  { %v353_v51 = vpack.c.bf16 %v4356_v36, %v204_v12  ;;  %v356_v5 = vpack.c.bf16 %v3972_v40, %v4356_v36 }
  0x81   :  { %1008 = vmatmul.mubr.bf16.gmra.mrb[20].mxu0 %v4339_v2 }
  0x82   :  { %1105 = vmatmul.mubr.bf16.gmra.mrb[20].mxu1 %v4343_v10  ;;  %1015 = vmatprep.mubr.bf16.mxu0 %v4347_v16 }
  0x83   :  { %1112 = vmatprep.mubr.bf16.mxu1 %v344_v19  ;;  %v3889_v19 = vld [vmem:[#allocation6 + $0x208] sm:$0xff]  }
  0x89   :  { %1016 = vmatmul.mubr.bf16.gmra.mrb[24].mxu0 %v4358_v38 }
  0x8a   :  { %1113 = vmatmul.mubr.bf16.gmra.mrb[24].mxu1 %v4362_v0  ;;  %1023 = vmatprep.mubr.bf16.mxu0 %v4366_v47 }
  0x8b   :  { %1120 = vmatprep.mubr.bf16.mxu1 %v353_v51  ;;  %v301_v51 = vpack.c.bf16 %v4267_v13, %v4246_v1  ;;  %v3893_v1 = vld [vmem:[#allocation6 + $0x228] sm:$0xff]   ;;  %v3895_v13 = vld [vmem:[#allocation6 + $0x238] sm:$0xff]  }
  0x91   :  { %1024 = vmatmul.mubr.bf16.gmra.mrb[28].mxu0 %v4376_v15 }
  0x92   :  { %1121 = vmatmul.mubr.bf16.gmra.mrb[28].mxu1 %v4380_v59  ;;  %1161 = vmatprep.mubr.bf16.mxu0 %v292_v17 }
  0x93   :  { %1258 = vmatprep.mubr.bf16.mxu1 %v4233_v53  ;;  %v3891_v53 = vld [vmem:[#allocation6 + $0x218] sm:$0xff]  }
  0x99   :  { %1162 = vmatmul.mubr.bf16.vlgmr.msra.gmra.mrb[32].mxu0 %v291_v37  ;;  %v3892_v37 = vld [vmem:[#allocation6 + $0x220] sm:$0xff]  }
  0x9a   :  { %3752 = vmatpush3.bf16.msra.mxu0 %v3888_v21  ;;  %1259 = vmatmul.mubr.bf16.vlgmr.msra.gmra.mrb[32].mxu1 %v4248_v4  ;;  %v321_v4 = vpack.c.bf16 %v262_v35, %v4237_v56 }
  0x9b   :  { %1169 = vmatprep.mubr.bf16.mxu0 %v301_v51  ;;  %3753 = vmatprep.subr.bf16.mxu0 %v3889_v19 }
  0x9c   :  { %1266 = vmatprep.mubr.bf16.mxu1 %v4258_v7  ;;  %v328_v7 = vpack.c.bf16 %v4334_v42, %v4317_v9 }
  0x9e   :  { %3754 = vmatpush3.bf16.msra.mxu0 %v3889_v19 }
  0x9f   :  { %3755 = vmatprep.subr.bf16.mxu0 %v3890_v61 }
  0xa1   :  { %1170 = vmatmul.mubr.bf16.gmra.mrb[36].mxu0 %v300_v41  ;;  %v320_v41 = vpack.c.bf16 %v3972_v40, %v4273_v18 }
  0xa2   :  { %1267 = vmatmul.mubr.bf16.gmra.mrb[36].mxu1 %v4277_v23  ;;  %1177 = vmatprep.mubr.bf16.mxu0 %v310_v49 }
  0xa3   :  { %1274 = vmatprep.mubr.bf16.mxu1 %v4288_v26  ;;  %3756 = vmatpush3.bf16.msra.mxu0 %v3890_v61 }
  0xa4   :  { %3757 = vmatprep.subr.bf16.mxu0 %v3891_v53 }
  0xa7   :  { %3758 = vmatpush3.bf16.msra.mxu0 %v3891_v53 }
  0xa8   :  { %3759 = vmatprep.subr.bf16.mxu0 %v3892_v37 }
  0xa9   :  { %1178 = vmatmul.mubr.bf16.gmra.mrb[40].mxu0 %v309_v46  ;;  %v237_v46 = vld [vmem:[#allocation2 + $0x122] sm:$0xff] }
  0xaa   :  { %1275 = vmatmul.mubr.bf16.gmra.mrb[40].mxu1 %v4301_v50  ;;  %1185 = vmatprep.mubr.bf16.mxu0 %v319_v62  ;;  %v355_v56 = vpack.c.bf16 %v237_v46, %v4372_v3  ;;  %v358_v18 = vpack.c.bf16 %v286_v14, %v237_v46 }
  0xab   :  { %1282 = vmatprep.mubr.bf16.mxu1 %v321_v4  ;;  %3760 = vmatpush3.bf16.msra.mxu0 %v3892_v37 }
  0xac   :  { %3761 = vmatprep.subr.bf16.mxu0 %v3893_v1 }
  0xaf   :  { %3762 = vmatpush3.bf16.msra.mxu0 %v3893_v1 }
  0xb0   :  { %3763 = vmatprep.subr.bf16.mxu0 %v3894_v39 }
  0xb1   :  { %1186 = vmatmul.mubr.bf16.gmra.mrb[44].mxu0 %v318_v60  ;;  %v357_v60 = vpack.c.bf16 %v270_v55, %v4324_v28  ;;  %v3897_v55 = vld [vmem:[#allocation8] sm:$0xff]  }
  0xb2   :  { %1283 = vmatmul.mubr.bf16.gmra.mrb[44].mxu1 %v320_v41  ;;  %1193 = vmatprep.mubr.bf16.mxu0 %v328_v7  ;;  %v3896_v7 = vld [vmem:[#allocation8 + $0x40] sm:$0xff]  }
  0xb3   :  { %1290 = vmatprep.mubr.bf16.mxu1 %v4329_v30  ;;  %3764 = vmatpush3.bf16.msra.mxu0 %v3894_v39 }
  0xb4   :  { %3765 = vmatprep.subr.bf16.mxu0 %v3895_v13  ;;  %3479 = vmatprep.subr.bf16.mxu1 %v3896_v7 }
  0xb5   :  { %3480 = vmatpush3.bf16.msra.mxu1 %v3897_v55  ;;  %v3908_v55 = vld [vmem:[#allocation8 + $0xc8] sm:$0xff]  }
  0xb7   :  { %3766 = vmatpush3.bf16.msra.mxu0 %v3895_v13 }
  0xb9   :  { %1194 = vmatmul.mubr.bf16.gmra.mrb[48].mxu0 %v327_v11  ;;  %v322_v11 = vpack.c.bf16 %v278_v8, %v229_v33 }
  0xba   :  { %1291 = vmatmul.mubr.bf16.gmra.mrb[48].mxu1 %v4339_v2  ;;  %1201 = vmatprep.mubr.bf16.mxu0 %v337_v43 }
  0xbb   :  { %1298 = vmatprep.mubr.bf16.mxu1 %v4347_v16 }
  0xc1   :  { %1202 = vmatmul.mubr.bf16.gmra.mrb[52].mxu0 %v336_v27 }
  0xc2   :  { %1299 = vmatmul.mubr.bf16.gmra.mrb[52].mxu1 %v4358_v38  ;;  %1209 = vmatprep.mubr.bf16.mxu0 %v346_v44 }
  0xc3   :  { %1306 = vmatprep.mubr.bf16.mxu1 %v4366_v47 }
  0xc9   :  { %1210 = vmatmul.mubr.bf16.gmra.mrb[56].mxu0 %v345_v63 }
  0xca   :  { %1307 = vmatmul.mubr.bf16.gmra.mrb[56].mxu1 %v4376_v15  ;;  %1217 = vmatprep.mubr.bf16.mxu0 %v355_v56 }
  0xcb   :  { %1314 = vmatprep.mubr.bf16.mxu1 %v357_v60 }
  0xd1   :  { %1218 = vmatmul.mubr.bf16.gmra.mrb[60].mxu0 %v354_v31 }
  0xd2   :  { %1315 = vmatmul.mubr.bf16.gmra.mrb[60].mxu1 %v356_v5  ;;  %3767 = vmatprep.mubr.bf16.mxu0 %v4254_v6 }
  0xd9   :  { %3768 = vmatmul.mubr.bf16.vlgmr.msra.gmra.mrb[64].mxu0 %v4284_v25 }
  0xda   :  { %3771 = vmatprep.mubr.bf16.mxu0 %v4307_v54 }
  0xe1   :  { %3772 = vmatmul.mubr.bf16.gmra.mrb[68].mxu0 %v322_v11 }
  0xe2   :  { %3775 = vmatprep.mubr.bf16.mxu0 %v4343_v10 }
  0xe9   :  { %3776 = vmatmul.mubr.bf16.gmra.mrb[72].mxu0 %v4362_v0 }
  0xea   :  { %3779 = vmatprep.mubr.bf16.mxu0 %v4380_v59 }
  0xf1   :  { %3780 = vmatmul.mubr.bf16.gmra.mrb[76].mxu0 %v358_v18 }
 0x12c   :  { %v3223_v22 = vpop.f32.mrb[0].mxu0 }
 0x12d   :  { %v3287_v23 = vpop.f32.mrb[0].mxu1  ;;  %v3224_v24 = vpop.f32.mrb[1].mxu0 }
 0x12e   :  { %v3225_v6 = vadd.f32 %v3224_v24, %v3223_v22  ;;  %v3288_v26 = vpop.f32.mrb[1].mxu1  ;;  %v3226_v25 = vpop.f32.mrb[2].mxu0 }
 0x12f   :  { %v3289_v27 = vadd.f32 %v3288_v26, %v3287_v23  ;;  %v3290_v32 = vpop.f32.mrb[2].mxu1  ;;  %v3227_v34 = vpop.f32.mrb[3].mxu0 }
 0x130   :  { %v3228_v50 = vadd.f32 %v3227_v34, %v3226_v25  ;;  %v3291_v52 = vpop.f32.mrb[3].mxu1 }
 0x131   :  { %v4444_v54 = vadd.f32 %v3289_v27, %v3225_v6  ;;  %v3292_v58 = vadd.f32 %v3291_v52, %v3290_v32 }
 0x133   :  { %v4446_v63 = vadd.f32 %v3292_v58, %v3228_v50 }
 0x134   :  { %v3229_v9 = vpop.f32.mrb[4].mxu0 }
 0x135   :  { %v3293_v20 = vpop.f32.mrb[4].mxu1  ;;  %v3230_v28 = vpop.f32.mrb[5].mxu0 }
 0x136   :  { %v3231_v30 = vadd.f32 %v3230_v28, %v3229_v9  ;;  %v3294_v31 = vpop.f32.mrb[5].mxu1  ;;  %v3232_v42 = vpop.f32.mrb[6].mxu0 }
 0x137   :  { %v3295_v45 = vadd.f32 %v3294_v31, %v3293_v20  ;;  %v3296_v2 = vpop.f32.mrb[6].mxu1  ;;  %v3233_v10 = vpop.f32.mrb[7].mxu0 }
 0x138   :  { %v3234_v16 = vadd.f32 %v3233_v10, %v3232_v42  ;;  %v3297_v21 = vpop.f32.mrb[7].mxu1 }
 0x139   :  { %v4448_v29 = vadd.f32 %v3295_v45, %v3231_v30  ;;  %v3298_v48 = vadd.f32 %v3297_v21, %v3296_v2 }
 0x13b   :  { %v4450_v12 = vadd.f32 %v3298_v48, %v3234_v16 }
 0x13c   :  { %v3235_v36 = vpop.f32.mrb[8].mxu0 }
 0x13d   :  { %v3299_v38 = vpop.f32.mrb[8].mxu1  ;;  %v3236_v0 = vpop.f32.mrb[9].mxu0 }
 0x13e   :  { %v3237_v47 = vadd.f32 %v3236_v0, %v3235_v36  ;;  %v3300_v57 = vpop.f32.mrb[9].mxu1  ;;  %v3238_v3 = vpop.f32.mrb[10].mxu0 }
 0x13f   :  { %v3301_v15 = vadd.f32 %v3300_v57, %v3299_v38  ;;  %v3302_v59 = vpop.f32.mrb[10].mxu1  ;;  %v3239_v17 = vpop.f32.mrb[11].mxu0 }
 0x140   :  { %v3240_v19 = vadd.f32 %v3239_v17, %v3238_v3  ;;  %v3303_v51 = vpop.f32.mrb[11].mxu1 }
 0x141   :  { %v4452_v61 = vadd.f32 %v3301_v15, %v3237_v47  ;;  %v3304_v49 = vadd.f32 %v3303_v51, %v3302_v59 }
 0x143   :  { %v4454_v53 = vadd.f32 %v3304_v49, %v3240_v19 }
 0x144   :  { %v3241_v33 = vpop.f32.mrb[12].mxu0 }
 0x145   :  { %v3305_v35 = vpop.f32.mrb[12].mxu1  ;;  %v3242_v37 = vpop.f32.mrb[13].mxu0 }
 0x146   :  { %v3243_v62 = vadd.f32 %v3242_v37, %v3241_v33  ;;  %v3306_v1 = vpop.f32.mrb[13].mxu1  ;;  %v3244_v4 = vpop.f32.mrb[14].mxu0  ;;  %v3905_v33 = vld [vmem:[#allocation8 + $0xc0] sm:$0xff]  }
 0x147   :  { %v3307_v39 = vadd.f32 %v3306_v1, %v3305_v35  ;;  %v3308_v40 = vpop.f32.mrb[14].mxu1  ;;  %v3245_v41 = vpop.f32.mrb[15].mxu0  ;;  %v3907_v37 = vld [vmem:[#allocation8 + $0x80] sm:$0xff]   ;;  %3543 = vmatprep.subr.bf16.mxu0 %v3905_v33 }
 0x148   :  { %v3246_v13 = vadd.f32 %v3245_v41, %v3244_v4  ;;  %v3309_v43 = vpop.f32.mrb[15].mxu1  ;;  %v3898_v41 = vld [vmem:[#allocation8 + $0x48] sm:$0xff]   ;;  %3544 = vmatpush3.bf16.msra.mxu0 %v3907_v37 }
 0x149   :  { %v4456_v44 = vadd.f32 %v3307_v39, %v3243_v62  ;;  %v3310_v46 = vadd.f32 %v3309_v43, %v3308_v40  ;;  %3481 = vmatprep.subr.bf16.mxu1 %v3898_v41  ;;  %3545 = vmatprep.subr.bf16.mxu0 %v3908_v55  ;;  %v3916_v55 = vld [vmem:[#allocation8 + $0x70] sm:$0xff]  }
 0x14b   :  { %v4458_v56 = vadd.f32 %v3310_v46, %v3246_v13  ;;  %v3899_v46 = vld [vmem:[#allocation8 + $0x8] sm:$0xff]  }
 0x14c   :  { %v3247_v60 = vpop.f32.mrb[16].mxu0  ;;  %3482 = vmatpush3.bf16.msra.mxu1 %v3899_v46 }
 0x14d   :  { %v3311_v5 = vpop.f32.mrb[16].mxu1  ;;  %v3248_v8 = vpop.f32.mrb[17].mxu0 }
 0x14e   :  { %v3249_v11 = vadd.f32 %v3248_v8, %v3247_v60  ;;  %v3312_v14 = vpop.f32.mrb[17].mxu1  ;;  %v3250_v18 = vpop.f32.mrb[18].mxu0  ;;  %v3909_v8 = vld [vmem:[#allocation8 + $0x88] sm:$0xff]  }
 0x14f   :  { %v3313_v22 = vadd.f32 %v3312_v14, %v3311_v5  ;;  %v3314_v23 = vpop.f32.mrb[18].mxu1  ;;  %v3251_v24 = vpop.f32.mrb[19].mxu0  ;;  %3546 = vmatpush3.bf16.msra.mxu0 %v3909_v8 }
 0x150   :  { %v3252_v6 = vadd.f32 %v3251_v24, %v3250_v18  ;;  %v3315_v26 = vpop.f32.mrb[19].mxu1  ;;  %v3900_v18 = vld [vmem:[#allocation8 + $0x50] sm:$0xff]  }
 0x151   :  { %v4460_v25 = vadd.f32 %v3313_v22, %v3249_v11  ;;  %v3316_v27 = vadd.f32 %v3315_v26, %v3314_v23  ;;  %v3901_v23 = vld [vmem:[#allocation8 + $0x10] sm:$0xff]   ;;  %3483 = vmatprep.subr.bf16.mxu1 %v3900_v18 }
 0x152   :  { %v3911_v24 = vld [vmem:[#allocation8 + $0xd0] sm:$0xff]   ;;  %3484 = vmatpush3.bf16.msra.mxu1 %v3901_v23 }
 0x153   :  { %v4462_v32 = vadd.f32 %v3316_v27, %v3252_v6  ;;  %v3913_v26 = vld [vmem:[#allocation8 + $0x90] sm:$0xff]   ;;  %3547 = vmatprep.subr.bf16.mxu0 %v3911_v24  ;;  %v3926_v24 = vld [vmem:[#allocation8 + $0xf8] sm:$0xff]  }
 0x154   :  { %v3253_v34 = vpop.f32.mrb[20].mxu0  ;;  %3548 = vmatpush3.bf16.msra.mxu0 %v3913_v26  ;;  %v3923_v18 = vld [vmem:[#allocation8 + $0xf0] sm:$0xff]  }
 0x155   :  { %v3317_v50 = vpop.f32.mrb[20].mxu1  ;;  %v3254_v52 = vpop.f32.mrb[21].mxu0  ;;  %v3925_v23 = vld [vmem:[#allocation8 + $0xb0] sm:$0xff]  }
 0x156   :  { %v3255_v58 = vadd.f32 %v3254_v52, %v3253_v34  ;;  %v3318_v9 = vpop.f32.mrb[21].mxu1  ;;  %v3256_v20 = vpop.f32.mrb[22].mxu0 }
 0x157   :  { %v3319_v28 = vadd.f32 %v3318_v9, %v3317_v50  ;;  %v3320_v30 = vpop.f32.mrb[22].mxu1  ;;  %v3257_v31 = vpop.f32.mrb[23].mxu0  ;;  %v3902_v9 = vld [vmem:[#allocation8 + $0x58] sm:$0xff]  }
 0x158   :  { %v3258_v42 = vadd.f32 %v3257_v31, %v3256_v20  ;;  %v3321_v45 = vpop.f32.mrb[23].mxu1  ;;  %v3903_v31 = vld [vmem:[#allocation8 + $0x18] sm:$0xff]   ;;  %3485 = vmatprep.subr.bf16.mxu1 %v3902_v9 }
 0x159   :  { %v4464_v2 = vadd.f32 %v3319_v28, %v3255_v58  ;;  %v3322_v10 = vadd.f32 %v3321_v45, %v3320_v30  ;;  %3486 = vmatpush3.bf16.msra.mxu1 %v3903_v31 }
 0x15b   :  { %v4466_v16 = vadd.f32 %v3322_v10, %v3258_v42  ;;  %v3914_v42 = vld [vmem:[#allocation8 + $0xd8] sm:$0xff]  }
 0x15c   :  { %v3259_v21 = vpop.f32.mrb[24].mxu0  ;;  %3549 = vmatprep.subr.bf16.mxu0 %v3914_v42 }
 0x15d   :  { %v3323_v48 = vpop.f32.mrb[24].mxu1  ;;  %v3260_v36 = vpop.f32.mrb[25].mxu0 }
 0x15e   :  { %v3261_v38 = vadd.f32 %v3260_v36, %v3259_v21  ;;  %v3324_v0 = vpop.f32.mrb[25].mxu1  ;;  %v3262_v47 = vpop.f32.mrb[26].mxu0 }
 0x15f   :  { %v3325_v57 = vadd.f32 %v3324_v0, %v3323_v48  ;;  %v3326_v3 = vpop.f32.mrb[26].mxu1  ;;  %v3263_v15 = vpop.f32.mrb[27].mxu0  ;;  %v3915_v48 = vld [vmem:[#allocation8 + $0x98] sm:$0xff]  }
 0x160   :  { %v3264_v59 = vadd.f32 %v3263_v15, %v3262_v47  ;;  %v3327_v17 = vpop.f32.mrb[27].mxu1  ;;  %v3904_v47 = vld [vmem:[#allocation8 + $0x60] sm:$0xff]   ;;  %3550 = vmatpush3.bf16.msra.mxu0 %v3915_v48 }
 0x161   :  { %v4468_v19 = vadd.f32 %v3325_v57, %v3261_v38  ;;  %v3328_v51 = vadd.f32 %v3327_v17, %v3326_v3  ;;  %v3906_v57 = vld [vmem:[#allocation8 + $0x20] sm:$0xff]   ;;  %3487 = vmatprep.subr.bf16.mxu1 %v3904_v47 }
 0x162   :  { %v3917_v3 = vld [vmem:[#allocation8 + $0xe0] sm:$0xff]   ;;  %3488 = vmatpush3.bf16.msra.mxu1 %v3906_v57 }
 0x163   :  { %v4470_v49 = vadd.f32 %v3328_v51, %v3264_v59  ;;  %3551 = vmatprep.subr.bf16.mxu0 %v3917_v3 }
 0x164   :  { %v3265_v35 = vpop.f32.mrb[28].mxu0 }
 0x165   :  { %v3329_v62 = vpop.f32.mrb[28].mxu1  ;;  %v3266_v1 = vpop.f32.mrb[29].mxu0 }
 0x166   :  { %v3267_v4 = vadd.f32 %v3266_v1, %v3265_v35  ;;  %v3330_v39 = vpop.f32.mrb[29].mxu1  ;;  %v3268_v40 = vpop.f32.mrb[30].mxu0 }
 0x167   :  { %v3331_v7 = vadd.f32 %v3330_v39, %v3329_v62  ;;  %v3332_v13 = vpop.f32.mrb[30].mxu1  ;;  %v3269_v43 = vpop.f32.mrb[31].mxu0  ;;  %v3910_v62 = vld [vmem:[#allocation8 + $0x68] sm:$0xff]  }
 0x168   :  { %v3270_v60 = vadd.f32 %v3269_v43, %v3268_v40  ;;  %v3333_v5 = vpop.f32.mrb[31].mxu1  ;;  %v3912_v39 = vld [vmem:[#allocation8 + $0x28] sm:$0xff]   ;;  %3489 = vmatprep.subr.bf16.mxu1 %v3910_v62 }
 0x169   :  { %v4472_v11 = vadd.f32 %v3331_v7, %v3267_v4  ;;  %v3334_v14 = vadd.f32 %v3333_v5, %v3332_v13  ;;  %v3920_v40 = vld [vmem:[#allocation8 + $0xe8] sm:$0xff]   ;;  %3490 = vmatpush3.bf16.msra.mxu1 %v3912_v39 }
 0x16a   :  { %v3921_v43 = vld [vmem:[#allocation8 + $0xa8] sm:$0xff]   ;;  %3491 = vmatprep.subr.bf16.mxu1 %v3916_v55 }
 0x16b   :  { %v4474_v22 = vadd.f32 %v3334_v14, %v3270_v60  ;;  %v3918_v60 = vld [vmem:[#allocation8 + $0x30] sm:$0xff]   ;;  %v3922_v14 = vld [vmem:[#allocation8 + $0x78] sm:$0xff]  }
 0x16c   :  { %v3351_v6 = vpop.f32.mrb[32].mxu0 }
 0x16d   :  { %v3352_v27 = vpop.f32.mrb[33].mxu0  ;;  %v3415_v34 = vpop.f32.mrb[32].mxu1  ;;  %3492 = vmatpush3.bf16.msra.mxu1 %v3918_v60 }
 0x16e   :  { %v3353_v50 = vadd.f32 %v3352_v27, %v3351_v6  ;;  %v3354_v52 = vpop.f32.mrb[34].mxu0  ;;  %v3416_v58 = vpop.f32.mrb[33].mxu1  ;;  %3493 = vmatprep.subr.bf16.mxu1 %v3922_v14 }
 0x16f   :  { %v3355_v20 = vpop.f32.mrb[35].mxu0  ;;  %v3417_v28 = vadd.f32 %v3416_v58, %v3415_v34  ;;  %v3418_v30 = vpop.f32.mrb[34].mxu1  ;;  %v3924_v34 = vld [vmem:[#allocation8 + $0x38] sm:$0xff]  }
 0x170   :  { %v1164_v45 = vadd.f32 %v3353_v50, %v4444_v54  ;;  %v3356_v10 = vadd.f32 %v3355_v20, %v3354_v52  ;;  %v3419_v21 = vpop.f32.mrb[35].mxu1  ;;  %v3919_v54 = vld [vmem:[#allocation8 + $0xa0] sm:$0xff]  }
 0x171   :  { %v3420_v36 = vadd.f32 %v3419_v21, %v3418_v30  ;;  %3552 = vmatpush3.bf16.msra.mxu0 %v3919_v54  ;;  %3494 = vmatpush3.bf16.msra.mxu1 %v3924_v34 }
 0x172   :  { %v1167_v38 = vadd.f32 %v3356_v10, %v4446_v63  ;;  %v4478_v0 = vadd.f32 %v3417_v28, %v1164_v45  ;;  %3553 = vmatprep.subr.bf16.mxu0 %v3920_v40 }
 0x174   :  { %v3357_v15 = vpop.f32.mrb[36].mxu0  ;;  %v4480_v59 = vadd.f32 %v3420_v36, %v1167_v38  ;;  %v3928_v38 = vld [vmem:[#allocation8 + $0x140] sm:$0xff]  }
 0x175   :  { %v3358_v17 = vpop.f32.mrb[37].mxu0  ;;  %v3421_v51 = vpop.f32.mrb[36].mxu1  ;;  %3554 = vmatpush3.bf16.msra.mxu0 %v3921_v43  ;;  %3607 = vmatprep.subr.bf16.mxu1 %v3928_v38 }
 0x176   :  { %v3359_v33 = vadd.f32 %v3358_v17, %v3357_v15  ;;  %v3360_v35 = vpop.f32.mrb[38].mxu0  ;;  %v3422_v37 = vpop.f32.mrb[37].mxu1  ;;  %3555 = vmatprep.subr.bf16.mxu0 %v3923_v18 }
 0x177   :  { %v3361_v63 = vpop.f32.mrb[39].mxu0  ;;  %v3423_v1 = vadd.f32 %v3422_v37, %v3421_v51  ;;  %v3424_v4 = vpop.f32.mrb[38].mxu1 }
 0x178   :  { %v1172_v41 = vadd.f32 %v3359_v33, %v4448_v29  ;;  %v3362_v7 = vadd.f32 %v3361_v63, %v3360_v35  ;;  %v3425_v13 = vpop.f32.mrb[39].mxu1 }
 0x179   :  { %v3426_v46 = vadd.f32 %v3425_v13, %v3424_v4  ;;  %3556 = vmatpush3.bf16.msra.mxu0 %v3925_v23 }
 0x17a   :  { %v1175_v5 = vadd.f32 %v3362_v7, %v4450_v12  ;;  %v4484_v8 = vadd.f32 %v3423_v1, %v1172_v41  ;;  %v3927_v12 = vld [vmem:[#allocation8 + $0xb8] sm:$0xff]   ;;  %3557 = vmatprep.subr.bf16.mxu0 %v3926_v24 }
 0x17c   :  { %v3363_v29 = vpop.f32.mrb[40].mxu0  ;;  %v4486_v6 = vadd.f32 %v3426_v46, %v1175_v5 }
 0x17d   :  { %v3364_v26 = vpop.f32.mrb[41].mxu0  ;;  %v3427_v27 = vpop.f32.mrb[40].mxu1  ;;  %3558 = vmatpush3.bf16.msra.mxu0 %v3927_v12 }
 0x17e   :  { %v3365_v50 = vadd.f32 %v3364_v26, %v3363_v29  ;;  %v3366_v52 = vpop.f32.mrb[42].mxu0  ;;  %v3428_v58 = vpop.f32.mrb[41].mxu1 }
 0x17f   :  { %v3367_v9 = vpop.f32.mrb[43].mxu0  ;;  %v3429_v20 = vadd.f32 %v3428_v58, %v3427_v27  ;;  %v3430_v28 = vpop.f32.mrb[42].mxu1 }
 0x180   :  { %v1180_v30 = vadd.f32 %v3365_v50, %v4452_v61  ;;  %v3368_v31 = vadd.f32 %v3367_v9, %v3366_v52  ;;  %v3431_v42 = vpop.f32.mrb[43].mxu1 }
 0x181   :  { %v3432_v45 = vadd.f32 %v3431_v42, %v3430_v28 }
 0x182   :  { %v1183_v10 = vadd.f32 %v3368_v31, %v4454_v53  ;;  %v4490_v21 = vadd.f32 %v3429_v20, %v1180_v30 }
 0x184   :  { %v3369_v48 = vpop.f32.mrb[44].mxu0  ;;  %v4492_v36 = vadd.f32 %v3432_v45, %v1183_v10 }
 0x185   :  { %v3370_v47 = vpop.f32.mrb[45].mxu0  ;;  %v3433_v57 = vpop.f32.mrb[44].mxu1 }
 0x186   :  { %v3371_v3 = vadd.f32 %v3370_v47, %v3369_v48  ;;  %v3372_v15 = vpop.f32.mrb[46].mxu0  ;;  %v3434_v54 = vpop.f32.mrb[45].mxu1 }
 0x187   :  { %v3373_v61 = vpop.f32.mrb[47].mxu0  ;;  %v3435_v17 = vadd.f32 %v3434_v54, %v3433_v57  ;;  %v3436_v51 = vpop.f32.mrb[46].mxu1 }
 0x188   :  { %v1188_v33 = vadd.f32 %v3371_v3, %v4456_v44  ;;  %v3374_v35 = vadd.f32 %v3373_v61, %v3372_v15  ;;  %v3437_v53 = vpop.f32.mrb[47].mxu1 }
 0x189   :  { %v3438_v37 = vadd.f32 %v3437_v53, %v3436_v51  ;;  %v3937_v53 = vld [vmem:[#allocation8 + $0x1c0] sm:$0xff]  }
 0x18a   :  { %v1191_v62 = vadd.f32 %v3374_v35, %v4458_v56  ;;  %v4496_v63 = vadd.f32 %v3435_v17, %v1188_v33  ;;  %3671 = vmatprep.subr.bf16.mxu0 %v3937_v53 }
 0x18c   :  { %v3375_v1 = vpop.f32.mrb[48].mxu0  ;;  %v4498_v4 = vadd.f32 %v3438_v37, %v1191_v62 }
 0x18d   :  { %v3376_v39 = vpop.f32.mrb[49].mxu0  ;;  %v3439_v40 = vpop.f32.mrb[48].mxu1 }
 0x18e   :  { %v3377_v41 = vadd.f32 %v3376_v39, %v3375_v1  ;;  %v3378_v7 = vpop.f32.mrb[50].mxu0  ;;  %v3440_v13 = vpop.f32.mrb[49].mxu1 }
 0x18f   :  { %v3379_v43 = vpop.f32.mrb[51].mxu0  ;;  %v3441_v46 = vadd.f32 %v3440_v13, %v3439_v40  ;;  %v3442_v55 = vpop.f32.mrb[50].mxu1 }
 0x190   :  { %v1196_v44 = vadd.f32 %v3377_v41, %v4460_v25  ;;  %v3380_v60 = vadd.f32 %v3379_v43, %v3378_v7  ;;  %v3443_v5 = vpop.f32.mrb[51].mxu1 }
 0x191   :  { %v3444_v14 = vadd.f32 %v3443_v5, %v3442_v55 }
 0x192   :  { %v1199_v56 = vadd.f32 %v3380_v60, %v4462_v32  ;;  %v4502_v18 = vadd.f32 %v3441_v46, %v1196_v44 }
 0x194   :  { %v3381_v23 = vpop.f32.mrb[52].mxu0  ;;  %v4504_v24 = vadd.f32 %v3444_v14, %v1199_v56 }
 0x195   :  { %v3382_v29 = vpop.f32.mrb[53].mxu0  ;;  %v3445_v26 = vpop.f32.mrb[52].mxu1 }
 0x196   :  { %v3383_v27 = vadd.f32 %v3382_v29, %v3381_v23  ;;  %v3384_v34 = vpop.f32.mrb[54].mxu0  ;;  %v3446_v50 = vpop.f32.mrb[53].mxu1 }
 0x197   :  { %v3385_v52 = vpop.f32.mrb[55].mxu0  ;;  %v3447_v58 = vadd.f32 %v3446_v50, %v3445_v26  ;;  %v3448_v12 = vpop.f32.mrb[54].mxu1 }
 0x198   :  { %v1204_v25 = vadd.f32 %v3383_v27, %v4464_v2  ;;  %v3386_v9 = vadd.f32 %v3385_v52, %v3384_v34  ;;  %v3449_v20 = vpop.f32.mrb[55].mxu1 }
 0x199   :  { %v3450_v28 = vadd.f32 %v3449_v20, %v3448_v12 }
 0x19a   :  { %v1207_v32 = vadd.f32 %v3386_v9, %v4466_v16  ;;  %v4508_v30 = vadd.f32 %v3447_v58, %v1204_v25 }
 0x19c   :  { %v3387_v31 = vpop.f32.mrb[56].mxu0  ;;  %v4510_v42 = vadd.f32 %v3450_v28, %v1207_v32 }
 0x19d   :  { %v3388_v45 = vpop.f32.mrb[57].mxu0  ;;  %v3451_v10 = vpop.f32.mrb[56].mxu1 }
 0x19e   :  { %v3389_v48 = vadd.f32 %v3388_v45, %v3387_v31  ;;  %v3390_v38 = vpop.f32.mrb[58].mxu0  ;;  %v3452_v47 = vpop.f32.mrb[57].mxu1 }
 0x19f   :  { %v3391_v57 = vpop.f32.mrb[59].mxu0  ;;  %v3453_v3 = vadd.f32 %v3452_v47, %v3451_v10  ;;  %v3454_v15 = vpop.f32.mrb[58].mxu1 }
 0x1a0   :  { %v1212_v2 = vadd.f32 %v3389_v48, %v4468_v19  ;;  %v3392_v54 = vadd.f32 %v3391_v57, %v3390_v38  ;;  %v3455_v61 = vpop.f32.mrb[59].mxu1 }
 0x1a1   :  { %v3456_v17 = vadd.f32 %v3455_v61, %v3454_v15 }
 0x1a2   :  { %v1215_v16 = vadd.f32 %v3392_v54, %v4470_v49  ;;  %v4514_v51 = vadd.f32 %v3453_v3, %v1212_v2 }
 0x1a4   :  { %v3393_v33 = vpop.f32.mrb[60].mxu0  ;;  %v4516_v35 = vadd.f32 %v3456_v17, %v1215_v16 }
 0x1a5   :  { %v3394_v37 = vpop.f32.mrb[61].mxu0  ;;  %v3457_v62 = vpop.f32.mrb[60].mxu1 }
 0x1a6   :  { %v3395_v1 = vadd.f32 %v3394_v37, %v3393_v33  ;;  %v3396_v39 = vpop.f32.mrb[62].mxu0  ;;  %v3458_v40 = vpop.f32.mrb[61].mxu1 }
 0x1a7   :  { %v3397_v41 = vpop.f32.mrb[63].mxu0  ;;  %v3459_v7 = vadd.f32 %v3458_v40, %v3457_v62  ;;  %v3460_v19 = vpop.f32.mrb[62].mxu1 }
 0x1a8   :  { %v1220_v13 = vadd.f32 %v3395_v1, %v4472_v11  ;;  %v3398_v43 = vadd.f32 %v3397_v41, %v3396_v39  ;;  %v3461_v46 = vpop.f32.mrb[63].mxu1 }
 0x1a9   :  { %v3462_v49 = vadd.f32 %v3461_v46, %v3460_v19 }
 0x1aa   :  { %v1223_v55 = vadd.f32 %v3398_v43, %v4474_v22  ;;  %v1317_v44 = vadd.f32 %v3459_v7, %v1220_v13 }
 0x1ac   :  { %v3769_v60 = vpop.f32.mrb[64].mxu0  ;;  %v1320_v5 = vadd.f32 %v3462_v49, %v1223_v55 }
 0x1ad   :  { %v4521_v14 = vadd.f32 %v3769_v60, %v4484_v8  ;;  %v1357_v56 = vpop.f32.mrb[65].mxu0 }
 0x1ae   :  { %v4524_v23 = vadd.f32 %v1357_v56, %v4478_v0  ;;  %v3770_v29 = vpop.f32.mrb[66].mxu0 }
 0x1af   :  { %v4527_v26 = vadd.f32 %v3770_v29, %v4486_v6  ;;  %v1360_v11 = vpop.f32.mrb[67].mxu0  ;;  %v1443_v0 = vmul.f32 %v4521_v14, %v4521_v14 }
 0x1b0   :  { %v4530_v27 = vadd.f32 %v1360_v11, %v4480_v59  ;;  %v1441_v22 = vmul.f32 %v4524_v23, %v4524_v23 }
 0x1b1   :  { %v1444_v12 = vmul.f32 %v4527_v26, %v4527_v26 }
 0x1b2   :  { %v1420_v34 = vadd.f32 %v4530_v27, %v4524_v23  ;;  %v1442_v8 = vmul.f32 %v4530_v27, %v4530_v27 }
 0x1b4   :  { %v1421_v50 = vadd.f32 %v1420_v34, %v4521_v14  ;;  %v1457_v6 = vadd.f32 %v1442_v8, %v1441_v22  ;;  %v3773_v52 = vpop.f32.mrb[68].mxu0 }
 0x1b5   :  { %v4542_v58 = vadd.f32 %v3773_v52, %v4496_v63  ;;  %v1373_v59 = vpop.f32.mrb[69].mxu0 }
 0x1b6   :  { %v1458_v25 = vadd.f32 %v1457_v6, %v1443_v0  ;;  %v4547_v9 = vadd.f32 %v1373_v59, %v4490_v21  ;;  %v1422_v20 = vadd.f32 %v1421_v50, %v4527_v26  ;;  %v3774_v28 = vpop.f32.mrb[70].mxu0 }
 0x1b7   :  { %v4551_v32 = vadd.f32 %v3774_v28, %v4498_v4  ;;  %v1376_v31 = vpop.f32.mrb[71].mxu0  ;;  %v1447_v4 = vmul.f32 %v4542_v58, %v4542_v58 }
 0x1b8   :  { %v1423_v45 = vadd.f32 %v1422_v20, %v4547_v9  ;;  %v1445_v63 = vmul.f32 %v4547_v9, %v4547_v9  ;;  %v1459_v10 = vadd.f32 %v1458_v25, %v1444_v12  ;;  %v4557_v48 = vadd.f32 %v1376_v31, %v4492_v36 }
 0x1b9   :  { %v1448_v36 = vmul.f32 %v4551_v32, %v4551_v32 }
 0x1ba   :  { %v1460_v38 = vadd.f32 %v1459_v10, %v1445_v63  ;;  %v1424_v21 = vadd.f32 %v1423_v45, %v4557_v48  ;;  %v1446_v47 = vmul.f32 %v4557_v48, %v4557_v48 }
 0x1bc   :  { %v1425_v57 = vadd.f32 %v1424_v21, %v4542_v58  ;;  %v1461_v3 = vadd.f32 %v1460_v38, %v1446_v47  ;;  %v3777_v15 = vpop.f32.mrb[72].mxu0 }
 0x1bd   :  { %v4566_v2 = vadd.f32 %v3777_v15, %v4508_v30  ;;  %v1389_v54 = vpop.f32.mrb[73].mxu0 }
 0x1be   :  { %v1462_v61 = vadd.f32 %v1461_v3, %v1447_v4  ;;  %v4571_v17 = vadd.f32 %v1389_v54, %v4502_v18  ;;  %v1426_v16 = vadd.f32 %v1425_v57, %v4551_v32  ;;  %v3778_v33 = vpop.f32.mrb[74].mxu0 }
 0x1bf   :  { %v4575_v53 = vadd.f32 %v3778_v33, %v4510_v42  ;;  %v1392_v37 = vpop.f32.mrb[75].mxu0  ;;  %v1451_v42 = vmul.f32 %v4566_v2, %v4566_v2 }
 0x1c0   :  { %v1427_v62 = vadd.f32 %v1426_v16, %v4571_v17  ;;  %v1449_v30 = vmul.f32 %v4571_v17, %v4571_v17  ;;  %v1463_v1 = vadd.f32 %v1462_v61, %v1448_v36  ;;  %v4581_v39 = vadd.f32 %v1392_v37, %v4504_v24 }
 0x1c1   :  { %v1452_v24 = vmul.f32 %v4575_v53, %v4575_v53 }
 0x1c2   :  { %v1464_v40 = vadd.f32 %v1463_v1, %v1449_v30  ;;  %v1428_v18 = vadd.f32 %v1427_v62, %v4581_v39  ;;  %v1450_v41 = vmul.f32 %v4581_v39, %v4581_v39 }
 0x1c4   :  { %v1429_v7 = vadd.f32 %v1428_v18, %v4566_v2  ;;  %v1465_v19 = vadd.f32 %v1464_v40, %v1450_v41  ;;  %v3781_v13 = vpop.f32.mrb[76].mxu0 }
 0x1c5   :  { %v4589_v43 = vadd.f32 %v3781_v13, %v1317_v44  ;;  %v1405_v46 = vpop.f32.mrb[77].mxu0  ;;  %v3133_v13 = vld [vmem:[%s5106_s3] ss:$0 sm:$0xff] }
 0x1c6   :  { %v1466_v49 = vadd.f32 %v1465_v19, %v1451_v42  ;;  %v4594_v55 = vadd.f32 %v1405_v46, %v4514_v51  ;;  %v1430_v60 = vadd.f32 %v1429_v7, %v4575_v53  ;;  %v3782_v56 = vpop.f32.mrb[78].mxu0 }
 0x1c7   :  { %v4597_v29 = vadd.f32 %v3782_v56, %v1320_v5  ;;  %v1408_v11 = vpop.f32.mrb[79].mxu0  ;;  %v1455_v51 = vmul.f32 %v4589_v43, %v4589_v43 }
 0x1c8   :  { %v1431_v22 = vadd.f32 %v1430_v60, %v4594_v55  ;;  %v1453_v44 = vmul.f32 %v4594_v55, %v4594_v55  ;;  %v1467_v34 = vadd.f32 %v1466_v49, %v1452_v24  ;;  %v1409_v8 = vadd.f32 %v1408_v11, %v4516_v35 }
 0x1c9   :  { %v1456_v5 = vmul.f32 %v4597_v29, %v4597_v29 }
 0x1ca   :  { %v1468_v0 = vadd.f32 %v1467_v34, %v1453_v44  ;;  %v1432_v50 = vadd.f32 %v1431_v22, %v1409_v8  ;;  %v1454_v6 = vmul.f32 %v1409_v8, %v1409_v8 }
 0x1cc   :  { %v1433_v52 = vadd.f32 %v1432_v50, %v4589_v43  ;;  %v1469_v59 = vadd.f32 %v1468_v0, %v1454_v6 }
 0x1ce   :  { %v1434_v12 = vadd.f32 %v1433_v52, %v4597_v29  ;;  %v1470_v25 = vadd.f32 %v1469_v59, %v1455_v51 }
 0x1d0   :  { %v1435_v20 = vrot.slane %v1434_v12, 4  ;;  %v1471_v28 = vadd.f32 %v1470_v25, %v1456_v5 }
 0x1d2   :  { %v1436_v31 = vadd.f32 %v1435_v20, %v1434_v12  ;;  %v1472_v45 = vrot.slane %v1471_v28, 4 }
 0x1d4   :  { %v1437_v35 = vrot.slane %v1436_v31, 2  ;;  %v1473_v63 = vadd.f32 %v1472_v45, %v1471_v28 }
 0x1d6   :  { %v1438_v10 = vadd.f32 %v1437_v35, %v1436_v31  ;;  %v1474_v38 = vrot.slane %v1473_v63, 2 }
 0x1d8   :  { %v1439_v21 = vrot.slane %v1438_v10, 1  ;;  %v1475_v47 = vadd.f32 %v1474_v38, %v1473_v63 }
 0x1da   :  { %v1440_v4 = vadd.f32 %v1439_v21, %v1438_v10  ;;  %v1476_v57 = vrot.slane %v1475_v47, 1 }
 0x1dc   :  { %v1477_v3 = vadd.f32 %v1476_v57, %v1475_v47  ;;  %v4609_v15 = vmul.f32 0.0078125, %v1440_v4 }
 0x1de   :  { %v1479_v54 = vmul.f32 0.0078125, %v1477_v3  ;;  %v1480_v36 = vmul.f32 %v4609_v15, %v4609_v15  ;;  %v1499_v61 = vsub.f32 %v1409_v8, %v4609_v15  ;;  %v1486_v16 = vsub.f32 %v4524_v23, %v4609_v15  ;;  %v1593_v8 = vld [vmem:[#allocation2 + $0x1] sm:$0xff] }
 0x1df   :  { %v1487_v33 = vsub.f32 %v4530_v27, %v4609_v15  ;;  %v1488_v37 = vsub.f32 %v4521_v14, %v4609_v15  ;;  %v1489_v62 = vsub.f32 %v4527_v26, %v4609_v15  ;;  %v1490_v30 = vsub.f32 %v4547_v9, %v4609_v15 }
 0x1e0   :  { %v1481_v1 = vsub.f32 %v1479_v54, %v1480_v36  ;;  %v1491_v40 = vsub.f32 %v4557_v48, %v4609_v15  ;;  %v1492_v18 = vsub.f32 %v4542_v58, %v4609_v15  ;;  %v1493_v23 = vsub.f32 %v4551_v32, %v4609_v15 }
 0x1e1   :  { %v1494_v27 = vsub.f32 %v4571_v17, %v4609_v15  ;;  %v1495_v14 = vsub.f32 %v4581_v39, %v4609_v15  ;;  %v1496_v26 = vsub.f32 %v4566_v2, %v4609_v15  ;;  %v1497_v9 = vsub.f32 %v4575_v53, %v4609_v15  ;;  %v1484_v2 = vld [vmem:[%s5105_s2] sm:$0x1] }
 0x1e2   :  { %v1482_v41 = vadd.f32 1e-05, %v1481_v1  ;;  %v1498_v48 = vsub.f32 %v4594_v55, %v4609_v15  ;;  %v1500_v58 = vsub.f32 %v4589_v43, %v4609_v15  ;;  %v1501_v32 = vsub.f32 %v4597_v29, %v4609_v15 }
 0x1e3   :  { %v1502_v17 = vlaneseq }
 0x1e4   :  { %3968 = vrsqrt.f32 %v1482_v41 }
 0x1e5   :  { %v4644_v42 = vshrl.u32 %v1502_v17, 7 }
 0x1e7   :  { %v1504_v53 = vsub.s32 0, %v4644_v42 }
 0x1ee   :  { %v3969_v39 = vpop.eup %3968 }
 0x1ef   :  { %v1485_v7 = vmul.f32 %v3969_v39, %v1484_v2 }
 0x1f1   :  { %v1505_v19 = vrot.slane %v1485_v7, %v1504_v53 }
 0x1f3   :  { %v1519_v43 = vmul.f32 %v1505_v19, %v1499_v61  ;;  %v1506_v46 = vmul.f32 %v1505_v19, %v1486_v16  ;;  %v1507_v24 = vmul.f32 %v1505_v19, %v1487_v33  ;;  %v1508_v49 = vmul.f32 %v1505_v19, %v1488_v37 }
 0x1f4   :  { %v1509_v55 = vmul.f32 %v1505_v19, %v1489_v62  ;;  %v1510_v60 = vmul.f32 %v1505_v19, %v1490_v30  ;;  %v1511_v56 = vmul.f32 %v1505_v19, %v1491_v40  ;;  %v1512_v29 = vmul.f32 %v1505_v19, %v1492_v18  ;;  %v1609_v40 = vld [vmem:[#allocation2 + $0x2] sm:$0xff] }
 0x1f5   :  { %v4655_v11 = vadd.f32 %v3133_v13, %v1519_v43  ;;  %v1529_v22 = vadd.f32 %v3133_v13, %v1506_v46  ;;  %v1530_v44 = vadd.f32 %v3133_v13, %v1507_v24  ;;  %v1531_v34 = vadd.f32 %v3133_v13, %v1508_v49 }
 0x1f6   :  { %v1532_v0 = vadd.f32 %v3133_v13, %v1509_v55  ;;  %v1533_v50 = vadd.f32 %v3133_v13, %v1510_v60  ;;  %v1534_v6 = vadd.f32 %v3133_v13, %v1511_v56  ;;  %v1535_v51 = vadd.f32 %v3133_v13, %v1512_v29  ;;  %v3929_v55 = vld [vmem:[#allocation8 + $0x100] sm:$0xff]   ;;  %v3930_v56 = vld [vmem:[#allocation8 + $0x148] sm:$0xff]  }
 0x1f7   :  { %v1558_v52 = vmax.f32 %v4655_v11, 0.0  ;;  %v4658_v59 = vmax.f32 %v1529_v22, 0.0  ;;  %v4660_v5 = vmax.f32 %v1530_v44, 0.0  ;;  %v4662_v12 = vmax.f32 %v1531_v34, 0.0  ;;  %v3939_v29 = vld [vmem:[#allocation8 + $0x180] sm:$0xff]   ;;  %v3940_v34 = vld [vmem:[#allocation8 + $0x1c8] sm:$0xff]  }
 0x1f8   :  { %v4664_v25 = vmax.f32 %v1532_v0, 0.0  ;;  %v4666_v20 = vmax.f32 %v1533_v50, 0.0  ;;  %v4668_v28 = vmax.f32 %v1534_v6, 0.0  ;;  %v4670_v31 = vmax.f32 %v1535_v51, 0.0  ;;  %v3932_v11 = vld [vmem:[#allocation8 + $0x150] sm:$0xff]   ;;  %v3941_v50 = vld [vmem:[#allocation8 + $0x188] sm:$0xff]  }
 0x1f9   :  { %1574 = vst [vmem:[#allocation2 + $0x101] sm:$0xff] %v1558_v52  ;;  %1561 = vst [vmem:[#allocation2 + $0x11] sm:$0xff] %v4658_v59  ;;  %v1722_v45 = vpack.c.bf16 %v4658_v59, %v1593_v8  ;;  %v4680_v35 = vpack.c.bf16 %v4662_v12, %v4660_v5  ;;  %v1513_v63 = vmul.f32 %v1505_v19, %v1493_v23  ;;  %v3931_v8 = vld [vmem:[#allocation8 + $0x108] sm:$0xff]  }
 0x1fa   :  { %1562 = vst [vmem:[#allocation2 + $0x21] sm:$0xff] %v4660_v5  ;;  %1563 = vst [vmem:[#allocation2 + $0x31] sm:$0xff] %v4662_v12  ;;  %v1514_v10 = vmul.f32 %v1505_v19, %v1494_v27  ;;  %v4686_v38 = vpack.c.bf16 %v4666_v20, %v4664_v25  ;;  %v4692_v21 = vpack.c.bf16 %v4670_v31, %v4668_v28 }
 0x1fb   :  { %1564 = vst [vmem:[#allocation2 + $0x41] sm:$0xff] %v4664_v25  ;;  %1565 = vst [vmem:[#allocation2 + $0x51] sm:$0xff] %v4666_v20  ;;  %v1515_v47 = vmul.f32 %v1505_v19, %v1495_v14  ;;  %v1516_v4 = vmul.f32 %v1505_v19, %v1496_v26  ;;  %2401 = vmatprep.mubr.bf16.mxu1 %v1722_v45  ;;  %v1536_v57 = vadd.f32 %v3133_v13, %v1513_v63  ;;  %v3943_v63 = vld [vmem:[#allocation8 + $0x1d0] sm:$0xff]  }
 0x1fc   :  { %1566 = vst [vmem:[#allocation2 + $0x61] sm:$0xff] %v4668_v28  ;;  %1567 = vst [vmem:[#allocation2 + $0x71] sm:$0xff] %v4670_v31  ;;  %v1537_v3 = vadd.f32 %v3133_v13, %v1514_v10  ;;  %v1517_v15 = vmul.f32 %v1505_v19, %v1497_v9  ;;  %v1518_v54 = vmul.f32 %v1505_v19, %v1498_v48 }
 0x1fd   :  { %v1538_v36 = vadd.f32 %v3133_v13, %v1515_v47  ;;  %v1539_v61 = vadd.f32 %v3133_v13, %v1516_v4  ;;  %v1520_v16 = vmul.f32 %v1505_v19, %v1500_v58  ;;  %v1521_v33 = vmul.f32 %v1505_v19, %v1501_v32 }
 0x1fe   :  { %v4694_v37 = vmax.f32 %v1536_v57, 0.0  ;;  %v4696_v62 = vmax.f32 %v1537_v3, 0.0  ;;  %v1540_v30 = vadd.f32 %v3133_v13, %v1517_v15  ;;  %v1541_v1 = vadd.f32 %v3133_v13, %v1518_v54  ;;  %v3933_v3 = vld [vmem:[#allocation8 + $0x110] sm:$0xff]   ;;  %v3934_v54 = vld [vmem:[#allocation8 + $0x158] sm:$0xff]  }
 0x1ff   :  { %v4698_v18 = vmax.f32 %v1538_v36, 0.0  ;;  %v4700_v23 = vmax.f32 %v1539_v61, 0.0  ;;  %v1543_v27 = vadd.f32 %v3133_v13, %v1520_v16  ;;  %v1544_v14 = vadd.f32 %v3133_v13, %v1521_v33  ;;  %v4724_v13 = vld [vmem:[#allocation2] sm:$0xff]  ;;  %v3945_v36 = vld [vmem:[#allocation8 + $0x190] sm:$0xff]   ;;  %v3946_v16 = vld [vmem:[#allocation8 + $0x1d8] sm:$0xff]  }
 0x200   :  { %1568 = vst [vmem:[#allocation2 + $0x81] sm:$0xff] %v4694_v37  ;;  %1569 = vst [vmem:[#allocation2 + $0xb1] sm:$0xff] %v4696_v62  ;;  %v4704_v26 = vmax.f32 %v1540_v30, 0.0  ;;  %v4706_v9 = vmax.f32 %v1541_v1, 0.0  ;;  %v1725_v41 = vpack.c.bf16 %v4660_v5, %v4658_v59  ;;  %v1625_v48 = vld [vmem:[#allocation2 + $0x10] sm:$0xff]  ;;  %v1734_v7 = vpack.c.bf16 %v4664_v25, %v4662_v12  ;;  %v3935_v33 = vld [vmem:[#allocation8 + $0x118] sm:$0xff]  }
 0x201   :  { %v1626_v58 = vld [vmem:[#allocation2 + $0x20] sm:$0xff]  ;;  %v4710_v32 = vld [vmem:[#allocation2 + $0x12] sm:$0xff]  ;;  %1570 = vst [vmem:[#allocation2 + $0xc1] sm:$0xff] %v4698_v18  ;;  %1571 = vst [vmem:[#allocation2 + $0xd1] sm:$0xff] %v4700_v23  ;;  %v4716_v17 = vpack.c.bf16 %v4700_v23, %v4698_v18  ;;  %v4718_v2 = vmax.f32 %v1543_v27, 0.0  ;;  %v4720_v39 = vmax.f32 %v1544_v14, 0.0  ;;  %v1721_v43 = vpack.c.bf16 %v1625_v48, %v4724_v13 }
 0x202   :  { %v1724_v19 = vpack.c.bf16 %v1626_v58, %v1625_v48  ;;  %v1723_v46 = vpack.c.bf16 %v4710_v32, %v1609_v40  ;;  %v1627_v24 = vld [vmem:[#allocation2 + $0x30] sm:$0xff]  ;;  %v1628_v49 = vld [vmem:[#allocation2 + $0x40] sm:$0xff]  ;;  %1572 = vst [vmem:[#allocation2 + $0xe1] sm:$0xff] %v4704_v26  ;;  %1573 = vst [vmem:[#allocation2 + $0xf1] sm:$0xff] %v4706_v9  ;;  %v4732_v60 = vpack.c.bf16 %v4706_v9, %v4704_v26 }
 0x203   :  { %1575 = vst [vmem:[#allocation2 + $0x111] sm:$0xff] %v4718_v2  ;;  %v4738_v22 = vpack.c.bf16 %v4718_v2, %v1558_v52  ;;  %1576 = vst [vmem:[#allocation2 + $0x121] sm:$0xff] %v4720_v39  ;;  %2402 = vmatmul.mubr.bf16.vlgmr.msra.gmra.mrb[64].mxu1 %v1721_v43  ;;  %v1733_v44 = vpack.c.bf16 %v1628_v49, %v1627_v24  ;;  %v1743_v0 = vpack.c.bf16 %v4668_v28, %v4666_v20  ;;  %v4748_v52 = vld [vmem:[#allocation2 + $0x22] sm:$0xff]  ;;  %v4750_v45 = vld [vmem:[#allocation2 + $0x32] sm:$0xff] }
 0x204   :  { %2498 = vmatprep.mubr.bf16.mxu0 %v1724_v19  ;;  %2409 = vmatprep.mubr.bf16.mxu1 %v4680_v35  ;;  %v1752_v6 = vpack.c.bf16 %v4694_v37, %v4670_v31  ;;  %v1761_v51 = vpack.c.bf16 %v4698_v18, %v4696_v62  ;;  %v1629_v10 = vld [vmem:[#allocation2 + $0x50] sm:$0xff]  ;;  %v1630_v47 = vld [vmem:[#allocation2 + $0x60] sm:$0xff]  ;;  %v1770_v4 = vpack.c.bf16 %v4704_v26, %v4700_v23  ;;  %v3947_v40 = vld [vmem:[#allocation8 + $0x198] sm:$0xff]  }
 0x205   :  { %2499 = vmatmul.mubr.bf16.vlgmr.msra.gmra.mrb[80].mxu0 %v1723_v46  ;;  %3608 = vmatpush3.bf16.msra.mxu1 %v3929_v55  ;;  %v4754_v57 = vpack.c.bf16 %v1627_v24, %v1626_v58  ;;  %v4758_v15 = vpack.c.bf16 %v4750_v45, %v4748_v52  ;;  %v1742_v61 = vpack.c.bf16 %v1630_v47, %v1629_v10  ;;  %v3936_v1 = vld [vmem:[#allocation8 + $0x160] sm:$0xff]   ;;  %v4767_v14 = vld [vmem:[#allocation2 + $0x52] sm:$0xff]  ;;  %v3942_v55 = vld [vmem:[#allocation8 + $0x168] sm:$0xff]  }
 0x206   :  { %2506 = vmatprep.mubr.bf16.mxu0 %v1733_v44  ;;  %3609 = vmatprep.subr.bf16.mxu1 %v3930_v56  ;;  %v1788_v30 = vpack.c.bf16 %v4720_v39, %v4718_v2  ;;  %v4765_v27 = vld [vmem:[#allocation2 + $0x42] sm:$0xff]  ;;  %v1631_v58 = vld [vmem:[#allocation2 + $0x70] sm:$0xff]  ;;  %v4771_v43 = vpack.c.bf16 %v1629_v10, %v1628_v49 }
 0x207   :  { %3672 = vmatpush3.bf16.msra.mxu0 %v3939_v29  ;;  %v3949_v48 = vld [vmem:[#allocation8 + $0x1e0] sm:$0xff]   ;;  %v4775_v24 = vpack.c.bf16 %v4767_v14, %v4765_v27  ;;  %v3952_v44 = vld [vmem:[#allocation8 + $0x1e8] sm:$0xff]   ;;  %v3955_v10 = vld [vmem:[#allocation8 + $0x1f0] sm:$0xff]  }
 0x208   :  { %3673 = vmatprep.subr.bf16.mxu0 %v3940_v34  ;;  %v4769_v19 = vld [vmem:[#allocation2 + $0x80] sm:$0xff]  ;;  %v3944_v49 = vld [vmem:[#allocation8 + $0x128] sm:$0xff]   ;;  %v3966_v25 = vld [vmem:[#allocation8 + $0x230] sm:$0xff]  }
 0x209   :  { %3610 = vmatpush3.bf16.msra.mxu1 %v3931_v8  ;;  %v3938_v46 = vld [vmem:[#allocation8 + $0x120] sm:$0xff]   ;;  %v1751_v29 = vpack.c.bf16 %v4769_v19, %v1631_v58  ;;  %v3948_v8 = vld [vmem:[#allocation8 + $0x170] sm:$0xff]  }
 0x20a   :  { %3611 = vmatprep.subr.bf16.mxu1 %v3932_v11  ;;  %v3951_v56 = vld [vmem:[#allocation8 + $0x1a0] sm:$0xff]   ;;  %v3953_v11 = vld [vmem:[#allocation8 + $0x1a8] sm:$0xff]   ;;  %v1704_v18 = vld [vmem:[#allocation2 + $0x131] sm:$0xff] }
 0x20b   :  { %3674 = vmatpush3.bf16.msra.mxu0 %v3941_v50  ;;  %2410 = vmatmul.mubr.bf16.gmra.mrb[68].mxu1 %v4754_v57  ;;  %v1601_v34 = vld [vmem:[#allocation2 + $0xa1] sm:$0xff]  ;;  %v1712_v26 = vld [vmem:[#allocation2 + $0x92] sm:$0xff] }
 0x20c   :  { %3675 = vmatprep.subr.bf16.mxu0 %v3943_v63  ;;  %2417 = vmatprep.mubr.bf16.mxu1 %v4686_v38  ;;  %v4781_v50 = vld [vmem:[#allocation2 + $0x62] sm:$0xff]  ;;  %v4783_v63 = vld [vmem:[#allocation2 + $0x72] sm:$0xff] }
 0x20d   :  { %2507 = vmatmul.mubr.bf16.gmra.mrb[84].mxu0 %v4758_v15  ;;  %3612 = vmatpush3.bf16.msra.mxu1 %v3933_v3  ;;  %v1633_v3 = vld [vmem:[#allocation2 + $0xb0] sm:$0xff]  ;;  %v3964_v59 = vld [vmem:[#allocation8 + $0x220] sm:$0xff]  }
 0x20e   :  { %2514 = vmatprep.mubr.bf16.mxu0 %v1742_v61  ;;  %3613 = vmatprep.subr.bf16.mxu1 %v3934_v54  ;;  %v1634_v54 = vld [vmem:[#allocation2 + $0xc0] sm:$0xff]  ;;  %v3950_v61 = vld [vmem:[#allocation8 + $0x130] sm:$0xff]  }
 0x20f   :  { %3676 = vmatpush3.bf16.msra.mxu0 %v3945_v36  ;;  %v4785_v36 = vpack.c.bf16 %v1631_v58, %v1630_v47  ;;  %v3956_v47 = vld [vmem:[#allocation8 + $0x138] sm:$0xff]   ;;  %v1664_v5 = vld [vmem:[#allocation2 + $0x82] sm:$0xff] }
 0x210   :  { %3677 = vmatprep.subr.bf16.mxu0 %v3946_v16  ;;  %v4789_v16 = vpack.c.bf16 %v4783_v63, %v4781_v50  ;;  %v3959_v58 = vld [vmem:[#allocation8 + $0x1b8] sm:$0xff]   ;;  %v1701_v28 = vld [vmem:[#allocation2 + $0x101] sm:$0xff] }
 0x211   :  { %3614 = vmatpush3.bf16.msra.mxu1 %v3935_v33  ;;  %v1758_v33 = vpack.c.bf16 %v4696_v62, %v1601_v34  ;;  %v1757_v34 = vpack.c.bf16 %v1633_v3, %v4724_v13  ;;  %v1672_v62 = vld [vmem:[#allocation2 + $0x122] sm:$0xff] }
 0x212   :  { %3615 = vmatprep.subr.bf16.mxu1 %v3936_v1  ;;  %v3954_v1 = vld [vmem:[#allocation8 + $0x178] sm:$0xff]  }
 0x213   :  { %3678 = vmatpush3.bf16.msra.mxu0 %v3947_v40  ;;  %2418 = vmatmul.mubr.bf16.gmra.mrb[72].mxu1 %v4771_v43  ;;  %v3957_v40 = vld [vmem:[#allocation8 + $0x1b0] sm:$0xff]  }
 0x214   :  { %3679 = vmatprep.subr.bf16.mxu0 %v3949_v48  ;;  %2425 = vmatprep.mubr.bf16.mxu1 %v4692_v21  ;;  %v1760_v48 = vpack.c.bf16 %v1634_v54, %v1633_v3 }
 0x215   :  { %2515 = vmatmul.mubr.bf16.gmra.mrb[88].mxu0 %v4775_v24  ;;  %3616 = vmatpush3.bf16.msra.mxu1 %v3938_v46  ;;  %v3958_v46 = vld [vmem:[#allocation8 + $0x1f8] sm:$0xff]  }
 0x216   :  { %2522 = vmatprep.mubr.bf16.mxu0 %v1751_v29  ;;  %3617 = vmatprep.subr.bf16.mxu1 %v3942_v55  ;;  %v3960_v55 = vld [vmem:[#allocation8 + $0x200] sm:$0xff]   ;;  %v4794_v29 = vld [vmem:[#allocation2 + $0xb2] sm:$0xff] }
 0x217   :  { %3680 = vmatpush3.bf16.msra.mxu0 %v3951_v56  ;;  %v1617_v56 = vld [vmem:[#allocation2 + $0xa2] sm:$0xff] }
 0x218   :  { %3681 = vmatprep.subr.bf16.mxu0 %v3952_v44  ;;  %v1635_v44 = vld [vmem:[#allocation2 + $0xd0] sm:$0xff] }
 0x219   :  { %3618 = vmatpush3.bf16.msra.mxu1 %v3944_v49  ;;  %v1636_v49 = vld [vmem:[#allocation2 + $0xe0] sm:$0xff] }
 0x21a   :  { %3619 = vmatprep.subr.bf16.mxu1 %v3948_v8  ;;  %v1759_v8 = vpack.c.bf16 %v4794_v29, %v1617_v56  ;;  %v4816_v56 = vld [vmem:[#allocation2 + $0x120] sm:$0xff] }
 0x21b   :  { %3682 = vmatpush3.bf16.msra.mxu0 %v3953_v11  ;;  %2426 = vmatmul.mubr.bf16.gmra.mrb[76].mxu1 %v4785_v36  ;;  %v1769_v11 = vpack.c.bf16 %v1636_v49, %v1635_v44  ;;  %v1790_v23 = vpack.c.bf16 %v4724_v13, %v4816_v56 }
 0x21c   :  { %3683 = vmatprep.subr.bf16.mxu0 %v3955_v10  ;;  %2433 = vmatprep.mubr.bf16.mxu1 %v1758_v33  ;;  %v4799_v10 = vld [vmem:[#allocation2 + $0xc2] sm:$0xff]  ;;  %v1637_v33 = vld [vmem:[#allocation2 + $0xf0] sm:$0xff] }
 0x21d   :  { %2523 = vmatmul.mubr.bf16.gmra.mrb[92].mxu0 %v4789_v16  ;;  %3620 = vmatpush3.bf16.msra.mxu1 %v3950_v61  ;;  %v4801_v61 = vld [vmem:[#allocation2 + $0xd2] sm:$0xff] }
 0x21e   :  { %2530 = vmatprep.mubr.bf16.mxu0 %v1760_v48  ;;  %3621 = vmatprep.subr.bf16.mxu1 %v3954_v1  ;;  %v1638_v1 = vld [vmem:[#allocation2 + $0x100] sm:$0xff]  ;;  %v4807_v3 = vpack.c.bf16 %v4801_v61, %v4799_v10 }
 0x21f   :  { %3684 = vmatpush3.bf16.msra.mxu0 %v3957_v40  ;;  %v4803_v40 = vpack.c.bf16 %v1635_v44, %v1634_v54  ;;  %v1778_v48 = vpack.c.bf16 %v1638_v1, %v1637_v33  ;;  %v4818_v54 = vpack.c.bf16 %v1637_v33, %v1636_v49  ;;  %v1726_v33 = vpack.c.bf16 %v4748_v52, %v4710_v32  ;;  %v3962_v32 = vld [vmem:[#allocation8 + $0x210] sm:$0xff]   ;;  %v3963_v52 = vld [vmem:[#allocation8 + $0x218] sm:$0xff]  }
 0x220   :  { %3685 = vmatprep.subr.bf16.mxu0 %v3958_v46  ;;  %v4812_v46 = vld [vmem:[#allocation2 + $0xe2] sm:$0xff] }
 0x221   :  { %3622 = vmatpush3.bf16.msra.mxu1 %v3956_v47  ;;  %v4814_v47 = vld [vmem:[#allocation2 + $0xf2] sm:$0xff]  ;;  %v1771_v20 = vpack.c.bf16 %v4812_v46, %v4801_v61 }
 0x222   :  { %3783 = vmatprep.subr.bf16.mxu1 %v3960_v55  ;;  %v4822_v44 = vpack.c.bf16 %v4814_v47, %v4812_v46 }
 0x223   :  { %3686 = vmatpush3.bf16.msra.mxu0 %v3959_v58  ;;  %2434 = vmatmul.mubr.bf16.gmra.mrb[80].mxu1 %v1757_v34  ;;  %v1639_v58 = vld [vmem:[#allocation2 + $0x110] sm:$0xff] }
 0x224   :  { %2441 = vmatprep.mubr.bf16.mxu1 %v4716_v17  ;;  %v1787_v34 = vpack.c.bf16 %v4816_v56, %v1639_v58 }
 0x225   :  { %2531 = vmatmul.mubr.bf16.gmra.mrb[96].mxu0 %v1759_v8  ;;  %v4828_v8 = vld [vmem:[#allocation2 + $0x102] sm:$0xff] }
 0x226   :  { %2538 = vmatprep.mubr.bf16.mxu0 %v1769_v11  ;;  %v4830_v11 = vld [vmem:[#allocation2 + $0x112] sm:$0xff]  ;;  %v1780_v31 = vpack.c.bf16 %v4828_v8, %v4814_v47 }
 0x227   :  { %v4836_v49 = vpack.c.bf16 %v4830_v11, %v4828_v8 }
 0x22b   :  { %2442 = vmatmul.mubr.bf16.gmra.mrb[84].mxu1 %v4803_v40 }
 0x22c   :  { %2449 = vmatprep.mubr.bf16.mxu1 %v4732_v60 }
 0x22d   :  { %2539 = vmatmul.mubr.bf16.gmra.mrb[100].mxu0 %v4807_v3 }
 0x22e   :  { %2546 = vmatprep.mubr.bf16.mxu0 %v1778_v48  ;;  %v4832_v48 = vpack.c.bf16 %v1639_v58, %v1638_v1 }
 0x233   :  { %2450 = vmatmul.mubr.bf16.gmra.mrb[88].mxu1 %v4818_v54 }
 0x234   :  { %2457 = vmatprep.mubr.bf16.mxu1 %v4738_v22  ;;  %v1735_v22 = vpack.c.bf16 %v4765_v27, %v4750_v45  ;;  %v3965_v45 = vld [vmem:[#allocation8 + $0x228] sm:$0xff]  }
 0x235   :  { %2547 = vmatmul.mubr.bf16.gmra.mrb[104].mxu0 %v4822_v44 }
 0x236   :  { %2554 = vmatprep.mubr.bf16.mxu0 %v1787_v34  ;;  %v3961_v34 = vld [vmem:[#allocation8 + $0x208] sm:$0xff]  }
 0x23b   :  { %2458 = vmatmul.mubr.bf16.gmra.mrb[92].mxu1 %v4832_v48 }
 0x23c   :  { %2595 = vmatprep.mubr.bf16.mxu1 %v1726_v33 }
 0x23d   :  { %2555 = vmatmul.mubr.bf16.gmra.mrb[108].mxu0 %v4836_v49 }
 0x23e   :  { %2692 = vmatprep.mubr.bf16.mxu0 %v4680_v35  ;;  %v1744_v35 = vpack.c.bf16 %v4781_v50, %v4767_v14 }
 0x243   :  { %2596 = vmatmul.mubr.bf16.vlgmr.msra.gmra.mrb[96].mxu1 %v1725_v41  ;;  %v1753_v41 = vpack.c.bf16 %v1664_v5, %v4783_v63 }
 0x244   :  { %2603 = vmatprep.mubr.bf16.mxu1 %v1735_v22  ;;  %3784 = vmatpush3.bf16.msra.mxu1 %v3960_v55 }
 0x245   :  { %2693 = vmatmul.mubr.bf16.vlgmr.msra.gmra.mrb[112].mxu0 %v4754_v57  ;;  %3785 = vmatprep.subr.bf16.mxu1 %v3961_v34  ;;  %v3967_v57 = vld [vmem:[#allocation8 + $0x238] sm:$0xff]  }
 0x246   :  { %2700 = vmatprep.mubr.bf16.mxu0 %v4686_v38  ;;  %v1696_v38 = vld [vmem:[#allocation2 + $0x91] sm:$0xff] }
 0x247   :  { %v1755_v12 = vpack.c.bf16 %v1696_v38, %v4694_v37  ;;  %v1782_v37 = vpack.c.bf16 %v4718_v2, %v1701_v28 }
 0x248   :  { %3786 = vmatpush3.bf16.msra.mxu1 %v3961_v34 }
 0x249   :  { %3787 = vmatprep.subr.bf16.mxu1 %v3962_v32 }
 0x24b   :  { %2604 = vmatmul.mubr.bf16.gmra.mrb[100].mxu1 %v1734_v7  ;;  %v1762_v7 = vpack.c.bf16 %v4799_v10, %v4794_v29 }
 0x24c   :  { %2611 = vmatprep.mubr.bf16.mxu1 %v1744_v35  ;;  %3788 = vmatpush3.bf16.msra.mxu1 %v3962_v32 }
 0x24d   :  { %2701 = vmatmul.mubr.bf16.gmra.mrb[116].mxu0 %v4771_v43  ;;  %3789 = vmatprep.subr.bf16.mxu1 %v3963_v52 }
 0x24e   :  { %2708 = vmatprep.mubr.bf16.mxu0 %v4692_v21  ;;  %v1754_v21 = vpack.c.bf16 %v4724_v13, %v4769_v19  ;;  %v1720_v13 = vld [vmem:[#allocation2 + $0x132] sm:$0xff] }
 0x250   :  { %3790 = vmatpush3.bf16.msra.mxu1 %v3963_v52 }
 0x251   :  { %3791 = vmatprep.subr.bf16.mxu1 %v3964_v59 }
 0x253   :  { %2612 = vmatmul.mubr.bf16.gmra.mrb[104].mxu1 %v1743_v0  ;;  %v1791_v0 = vpack.c.bf16 %v1704_v18, %v4720_v39 }
 0x254   :  { %2619 = vmatprep.mubr.bf16.mxu1 %v1753_v41  ;;  %3792 = vmatpush3.bf16.msra.mxu1 %v3964_v59 }
 0x255   :  { %2709 = vmatmul.mubr.bf16.gmra.mrb[120].mxu0 %v4785_v36  ;;  %3793 = vmatprep.subr.bf16.mxu1 %v3965_v45 }
 0x256   :  { %2716 = vmatprep.mubr.bf16.mxu0 %v1755_v12 }
 0x258   :  { %3794 = vmatpush3.bf16.msra.mxu1 %v3965_v45 }
 0x259   :  { %3795 = vmatprep.subr.bf16.mxu1 %v3966_v25 }
 0x25b   :  { %2620 = vmatmul.mubr.bf16.gmra.mrb[108].mxu1 %v1752_v6  ;;  %v1792_v6 = vpack.c.bf16 %v1720_v13, %v1672_v62 }
 0x25c   :  { %2627 = vmatprep.mubr.bf16.mxu1 %v1762_v7  ;;  %3796 = vmatpush3.bf16.msra.mxu1 %v3966_v25 }
 0x25d   :  { %2717 = vmatmul.mubr.bf16.gmra.mrb[124].mxu0 %v1754_v21  ;;  %3797 = vmatprep.subr.bf16.mxu1 %v3967_v57 }
 0x25e   :  { %2724 = vmatprep.mubr.bf16.mxu0 %v4716_v17  ;;  %v1779_v17 = vpack.c.bf16 %v1701_v28, %v4706_v9  ;;  %v1756_v9 = vpack.c.bf16 %v1712_v26, %v1664_v5 }
 0x260   :  { %3798 = vmatpush3.bf16.msra.mxu1 %v3967_v57 }
 0x263   :  { %2628 = vmatmul.mubr.bf16.gmra.mrb[112].mxu1 %v1761_v51 }
 0x264   :  { %2635 = vmatprep.mubr.bf16.mxu1 %v1771_v20 }
 0x265   :  { %2725 = vmatmul.mubr.bf16.gmra.mrb[128].mxu0 %v4803_v40 }
 0x266   :  { %2732 = vmatprep.mubr.bf16.mxu0 %v4732_v60  ;;  %v1789_v60 = vpack.c.bf16 %v1672_v62, %v4830_v11 }
 0x26b   :  { %2636 = vmatmul.mubr.bf16.gmra.mrb[116].mxu1 %v1770_v4 }
 0x26c   :  { %2643 = vmatprep.mubr.bf16.mxu1 %v1780_v31 }
 0x26d   :  { %2733 = vmatmul.mubr.bf16.gmra.mrb[132].mxu0 %v4818_v54 }
 0x26e   :  { %2740 = vmatprep.mubr.bf16.mxu0 %v1782_v37 }
 0x273   :  { %2644 = vmatmul.mubr.bf16.gmra.mrb[120].mxu1 %v1779_v17 }
 0x274   :  { %2651 = vmatprep.mubr.bf16.mxu1 %v1789_v60 }
 0x275   :  { %2741 = vmatmul.mubr.bf16.gmra.mrb[136].mxu0 %v4832_v48 }
 0x276   :  { %2748 = vmatprep.mubr.bf16.mxu0 %v1791_v0 }
 0x27b   :  { %2652 = vmatmul.mubr.bf16.gmra.mrb[124].mxu1 %v1788_v30 }
 0x27c   :  { %3799 = vmatprep.mubr.bf16.mxu1 %v4758_v15 }
 0x27d   :  { %2749 = vmatmul.mubr.bf16.gmra.mrb[140].mxu0 %v1790_v23 }
 0x283   :  { %3800 = vmatmul.mubr.bf16.vlgmr.msra.gmra.mrb[128].mxu1 %v4775_v24 }
 0x284   :  { %3803 = vmatprep.mubr.bf16.mxu1 %v4789_v16 }
 0x28b   :  { %3804 = vmatmul.mubr.bf16.gmra.mrb[132].mxu1 %v1756_v9 }
 0x28c   :  { %3807 = vmatprep.mubr.bf16.mxu1 %v4807_v3 }
 0x293   :  { %3808 = vmatmul.mubr.bf16.gmra.mrb[136].mxu1 %v4822_v44 }
 0x294   :  { %3811 = vmatprep.mubr.bf16.mxu1 %v4836_v49 }
 0x29b   :  { %3812 = vmatmul.mubr.bf16.gmra.mrb[140].mxu1 %v1792_v6 }
 0x2d6   :  { %v3495_v2 = vpop.f32.mrb[64].mxu1 }
 0x2d7   :  { %v3496_v51 = vpop.f32.mrb[65].mxu1 }
 0x2d8   :  { %v3559_v39 = vpop.f32.mrb[80].mxu0  ;;  %v3497_v4 = vadd.f32 %v3496_v51, %v3495_v2  ;;  %v3498_v30 = vpop.f32.mrb[66].mxu1 }
 0x2d9   :  { %v3560_v15 = vpop.f32.mrb[81].mxu0  ;;  %v3499_v19 = vpop.f32.mrb[67].mxu1 }
 0x2da   :  { %v3561_v27 = vadd.f32 %v3560_v15, %v3559_v39  ;;  %v3562_v14 = vpop.f32.mrb[82].mxu0  ;;  %v3500_v43 = vadd.f32 %v3499_v19, %v3498_v30 }
 0x2db   :  { %v3563_v24 = vpop.f32.mrb[83].mxu0 }
 0x2dc   :  { %v4900_v50 = vadd.f32 %v3561_v27, %v3497_v4  ;;  %v3564_v63 = vadd.f32 %v3563_v24, %v3562_v14 }
 0x2de   :  { %v4902_v36 = vadd.f32 %v3564_v63, %v3500_v43  ;;  %v3501_v16 = vpop.f32.mrb[68].mxu1 }
 0x2df   :  { %v3502_v29 = vpop.f32.mrb[69].mxu1 }
 0x2e0   :  { %v3565_v55 = vpop.f32.mrb[84].mxu0  ;;  %v3503_v10 = vadd.f32 %v3502_v29, %v3501_v16  ;;  %v3504_v1 = vpop.f32.mrb[70].mxu1 }
 0x2e1   :  { %v3566_v61 = vpop.f32.mrb[85].mxu0  ;;  %v3505_v46 = vpop.f32.mrb[71].mxu1 }
 0x2e2   :  { %v3567_v40 = vadd.f32 %v3566_v61, %v3565_v55  ;;  %v3568_v3 = vpop.f32.mrb[86].mxu0  ;;  %v3506_v47 = vadd.f32 %v3505_v46, %v3504_v1 }
 0x2e3   :  { %v3569_v58 = vpop.f32.mrb[87].mxu0 }
 0x2e4   :  { %v4904_v56 = vadd.f32 %v3567_v40, %v3503_v10  ;;  %v3570_v54 = vadd.f32 %v3569_v58, %v3568_v3 }
 0x2e6   :  { %v4906_v44 = vadd.f32 %v3570_v54, %v3506_v47  ;;  %v3507_v8 = vpop.f32.mrb[72].mxu1 }
 0x2e7   :  { %v3508_v48 = vpop.f32.mrb[73].mxu1 }
 0x2e8   :  { %v3571_v11 = vpop.f32.mrb[88].mxu0  ;;  %v3509_v49 = vadd.f32 %v3508_v48, %v3507_v8  ;;  %v3510_v22 = vpop.f32.mrb[74].mxu1 }
 0x2e9   :  { %v3572_v33 = vpop.f32.mrb[89].mxu0  ;;  %v3511_v35 = vpop.f32.mrb[75].mxu1 }
 0x2ea   :  { %v3573_v34 = vadd.f32 %v3572_v33, %v3571_v11  ;;  %v3574_v32 = vpop.f32.mrb[90].mxu0  ;;  %v3512_v52 = vadd.f32 %v3511_v35, %v3510_v22 }
 0x2eb   :  { %v3575_v59 = vpop.f32.mrb[91].mxu0 }
 0x2ec   :  { %v4908_v5 = vadd.f32 %v3573_v34, %v3509_v49  ;;  %v3576_v38 = vadd.f32 %v3575_v59, %v3574_v32 }
 0x2ee   :  { %v4910_v41 = vadd.f32 %v3576_v38, %v3512_v52  ;;  %v3513_v45 = vpop.f32.mrb[76].mxu1 }
 0x2ef   :  { %v3514_v25 = vpop.f32.mrb[77].mxu1 }
 0x2f0   :  { %v3577_v12 = vpop.f32.mrb[92].mxu0  ;;  %v3515_v21 = vadd.f32 %v3514_v25, %v3513_v45  ;;  %v3516_v57 = vpop.f32.mrb[78].mxu1 }
 0x2f1   :  { %v3578_v7 = vpop.f32.mrb[93].mxu0  ;;  %v3517_v31 = vpop.f32.mrb[79].mxu1 }
 0x2f2   :  { %v3579_v20 = vadd.f32 %v3578_v7, %v3577_v12  ;;  %v3580_v28 = vpop.f32.mrb[94].mxu0  ;;  %v3518_v37 = vadd.f32 %v3517_v31, %v3516_v57 }
 0x2f3   :  { %v3581_v62 = vpop.f32.mrb[95].mxu0 }
 0x2f4   :  { %v4912_v18 = vadd.f32 %v3579_v20, %v3515_v21  ;;  %v3582_v17 = vadd.f32 %v3581_v62, %v3580_v28 }
 0x2f6   :  { %v4914_v60 = vadd.f32 %v3582_v17, %v3518_v37  ;;  %v3519_v0 = vpop.f32.mrb[80].mxu1 }
 0x2f7   :  { %v3520_v26 = vpop.f32.mrb[81].mxu1 }
 0x2f8   :  { %v3583_v23 = vpop.f32.mrb[96].mxu0  ;;  %v3521_v9 = vadd.f32 %v3520_v26, %v3519_v0  ;;  %v3522_v6 = vpop.f32.mrb[82].mxu1 }
 0x2f9   :  { %v3584_v13 = vpop.f32.mrb[97].mxu0  ;;  %v3523_v51 = vpop.f32.mrb[83].mxu1 }
 0x2fa   :  { %v3585_v2 = vadd.f32 %v3584_v13, %v3583_v23  ;;  %v3586_v39 = vpop.f32.mrb[98].mxu0  ;;  %v3524_v4 = vadd.f32 %v3523_v51, %v3522_v6 }
 0x2fb   :  { %v3587_v15 = vpop.f32.mrb[99].mxu0 }
 0x2fc   :  { %v4916_v30 = vadd.f32 %v3585_v2, %v3521_v9  ;;  %v3588_v27 = vadd.f32 %v3587_v15, %v3586_v39 }
 0x2fe   :  { %v4918_v14 = vadd.f32 %v3588_v27, %v3524_v4  ;;  %v3525_v19 = vpop.f32.mrb[84].mxu1 }
 0x2ff   :  { %v3526_v24 = vpop.f32.mrb[85].mxu1 }
 0x300   :  { %v3589_v43 = vpop.f32.mrb[100].mxu0  ;;  %v3527_v63 = vadd.f32 %v3526_v24, %v3525_v19  ;;  %v3528_v55 = vpop.f32.mrb[86].mxu1 }
 0x301   :  { %v3590_v16 = vpop.f32.mrb[101].mxu0  ;;  %v3529_v61 = vpop.f32.mrb[87].mxu1 }
 0x302   :  { %v3591_v29 = vadd.f32 %v3590_v16, %v3589_v43  ;;  %v3592_v10 = vpop.f32.mrb[102].mxu0  ;;  %v3530_v1 = vadd.f32 %v3529_v61, %v3528_v55 }
 0x303   :  { %v3593_v40 = vpop.f32.mrb[103].mxu0 }
 0x304   :  { %v4920_v3 = vadd.f32 %v3591_v29, %v3527_v63  ;;  %v3594_v46 = vadd.f32 %v3593_v40, %v3592_v10 }
 0x306   :  { %v4922_v47 = vadd.f32 %v3594_v46, %v3530_v1  ;;  %v3531_v58 = vpop.f32.mrb[88].mxu1 }
 0x307   :  { %v3532_v8 = vpop.f32.mrb[89].mxu1 }
 0x308   :  { %v3595_v54 = vpop.f32.mrb[104].mxu0  ;;  %v3533_v11 = vadd.f32 %v3532_v8, %v3531_v58  ;;  %v3534_v49 = vpop.f32.mrb[90].mxu1 }
 0x309   :  { %v3596_v48 = vpop.f32.mrb[105].mxu0  ;;  %v3535_v34 = vpop.f32.mrb[91].mxu1 }
 0x30a   :  { %v3597_v33 = vadd.f32 %v3596_v48, %v3595_v54  ;;  %v3598_v22 = vpop.f32.mrb[106].mxu0  ;;  %v3536_v32 = vadd.f32 %v3535_v34, %v3534_v49 }
 0x30b   :  { %v3599_v35 = vpop.f32.mrb[107].mxu0 }
 0x30c   :  { %v4924_v52 = vadd.f32 %v3597_v33, %v3533_v11  ;;  %v3600_v59 = vadd.f32 %v3599_v35, %v3598_v22 }
 0x30e   :  { %v4926_v38 = vadd.f32 %v3600_v59, %v3536_v32  ;;  %v3537_v45 = vpop.f32.mrb[92].mxu1 }
 0x30f   :  { %v3538_v25 = vpop.f32.mrb[93].mxu1 }
 0x310   :  { %v3601_v12 = vpop.f32.mrb[108].mxu0  ;;  %v3539_v21 = vadd.f32 %v3538_v25, %v3537_v45  ;;  %v3540_v57 = vpop.f32.mrb[94].mxu1 }
 0x311   :  { %v3602_v7 = vpop.f32.mrb[109].mxu0  ;;  %v3541_v31 = vpop.f32.mrb[95].mxu1 }
 0x312   :  { %v3603_v20 = vadd.f32 %v3602_v7, %v3601_v12  ;;  %v3604_v28 = vpop.f32.mrb[110].mxu0  ;;  %v3542_v37 = vadd.f32 %v3541_v31, %v3540_v57 }
 0x313   :  { %v3605_v62 = vpop.f32.mrb[111].mxu0 }
 0x314   :  { %v4928_v17 = vadd.f32 %v3603_v20, %v3539_v21  ;;  %v3606_v0 = vadd.f32 %v3605_v62, %v3604_v28 }
 0x316   :  { %v4930_v23 = vadd.f32 %v3606_v0, %v3542_v37  ;;  %v3623_v26 = vpop.f32.mrb[96].mxu1 }
 0x317   :  { %v3624_v13 = vpop.f32.mrb[97].mxu1 }
 0x318   :  { %v3687_v9 = vpop.f32.mrb[112].mxu0  ;;  %v3625_v6 = vadd.f32 %v3624_v13, %v3623_v26  ;;  %v3626_v39 = vpop.f32.mrb[98].mxu1 }
 0x319   :  { %v3688_v2 = vpop.f32.mrb[113].mxu0  ;;  %v3627_v15 = vpop.f32.mrb[99].mxu1 }
 0x31a   :  { %v3689_v51 = vadd.f32 %v3688_v2, %v3687_v9  ;;  %v3690_v4 = vpop.f32.mrb[114].mxu0  ;;  %v2598_v27 = vadd.f32 %v3625_v6, %v4900_v50  ;;  %v3628_v19 = vadd.f32 %v3627_v15, %v3626_v39 }
 0x31b   :  { %v3691_v43 = vpop.f32.mrb[115].mxu0 }
 0x31c   :  { %v3692_v24 = vadd.f32 %v3691_v43, %v3690_v4  ;;  %v2601_v63 = vadd.f32 %v3628_v19, %v4902_v36  ;;  %v4934_v16 = vadd.f32 %v3689_v51, %v2598_v27 }
 0x31e   :  { %v3629_v55 = vpop.f32.mrb[100].mxu1  ;;  %v4936_v29 = vadd.f32 %v3692_v24, %v2601_v63 }
 0x31f   :  { %v3630_v61 = vpop.f32.mrb[101].mxu1 }
 0x320   :  { %v3693_v10 = vpop.f32.mrb[116].mxu0  ;;  %v3631_v1 = vadd.f32 %v3630_v61, %v3629_v55  ;;  %v3632_v46 = vpop.f32.mrb[102].mxu1 }
 0x321   :  { %v3694_v40 = vpop.f32.mrb[117].mxu0  ;;  %v3633_v8 = vpop.f32.mrb[103].mxu1 }
 0x322   :  { %v3695_v58 = vadd.f32 %v3694_v40, %v3693_v10  ;;  %v3696_v54 = vpop.f32.mrb[118].mxu0  ;;  %v2606_v50 = vadd.f32 %v3631_v1, %v4904_v56  ;;  %v3634_v11 = vadd.f32 %v3633_v8, %v3632_v46 }
 0x323   :  { %v3697_v48 = vpop.f32.mrb[119].mxu0 }
 0x324   :  { %v3698_v49 = vadd.f32 %v3697_v48, %v3696_v54  ;;  %v2609_v36 = vadd.f32 %v3634_v11, %v4906_v44  ;;  %v4940_v33 = vadd.f32 %v3695_v58, %v2606_v50 }
 0x326   :  { %v3635_v22 = vpop.f32.mrb[104].mxu1  ;;  %v4942_v34 = vadd.f32 %v3698_v49, %v2609_v36 }
 0x327   :  { %v3636_v35 = vpop.f32.mrb[105].mxu1 }
 0x328   :  { %v3699_v32 = vpop.f32.mrb[120].mxu0  ;;  %v3637_v59 = vadd.f32 %v3636_v35, %v3635_v22  ;;  %v3638_v12 = vpop.f32.mrb[106].mxu1 }
 0x329   :  { %v3700_v45 = vpop.f32.mrb[121].mxu0  ;;  %v3639_v7 = vpop.f32.mrb[107].mxu1 }
 0x32a   :  { %v3701_v25 = vadd.f32 %v3700_v45, %v3699_v32  ;;  %v3702_v21 = vpop.f32.mrb[122].mxu0  ;;  %v2614_v56 = vadd.f32 %v3637_v59, %v4908_v5  ;;  %v3640_v57 = vadd.f32 %v3639_v7, %v3638_v12 }
 0x32b   :  { %v3703_v20 = vpop.f32.mrb[123].mxu0 }
 0x32c   :  { %v3704_v28 = vadd.f32 %v3703_v20, %v3702_v21  ;;  %v2617_v44 = vadd.f32 %v3640_v57, %v4910_v41  ;;  %v4946_v31 = vadd.f32 %v3701_v25, %v2614_v56 }
 0x32e   :  { %v3641_v37 = vpop.f32.mrb[108].mxu1  ;;  %v4948_v62 = vadd.f32 %v3704_v28, %v2617_v44 }
 0x32f   :  { %v3642_v26 = vpop.f32.mrb[109].mxu1 }
 0x330   :  { %v3705_v0 = vpop.f32.mrb[124].mxu0  ;;  %v3643_v9 = vadd.f32 %v3642_v26, %v3641_v37  ;;  %v3644_v6 = vpop.f32.mrb[110].mxu1 }
 0x331   :  { %v3706_v13 = vpop.f32.mrb[125].mxu0  ;;  %v3645_v51 = vpop.f32.mrb[111].mxu1 }
 0x332   :  { %v3707_v2 = vadd.f32 %v3706_v13, %v3705_v0  ;;  %v3708_v39 = vpop.f32.mrb[126].mxu0  ;;  %v2622_v5 = vadd.f32 %v3643_v9, %v4912_v18  ;;  %v3646_v4 = vadd.f32 %v3645_v51, %v3644_v6 }
 0x333   :  { %v3709_v15 = vpop.f32.mrb[127].mxu0 }
 0x334   :  { %v3710_v27 = vadd.f32 %v3709_v15, %v3708_v39  ;;  %v2625_v41 = vadd.f32 %v3646_v4, %v4914_v60  ;;  %v4952_v19 = vadd.f32 %v3707_v2, %v2622_v5 }
 0x336   :  { %v3647_v43 = vpop.f32.mrb[112].mxu1  ;;  %v4954_v24 = vadd.f32 %v3710_v27, %v2625_v41 }
 0x337   :  { %v3648_v55 = vpop.f32.mrb[113].mxu1 }
 0x338   :  { %v3711_v63 = vpop.f32.mrb[128].mxu0  ;;  %v3649_v10 = vadd.f32 %v3648_v55, %v3647_v43  ;;  %v3650_v1 = vpop.f32.mrb[114].mxu1 }
 0x339   :  { %v3712_v61 = vpop.f32.mrb[129].mxu0  ;;  %v3651_v58 = vpop.f32.mrb[115].mxu1 }
 0x33a   :  { %v3713_v40 = vadd.f32 %v3712_v61, %v3711_v63  ;;  %v3714_v46 = vpop.f32.mrb[130].mxu0  ;;  %v2630_v18 = vadd.f32 %v3649_v10, %v4916_v30  ;;  %v3652_v54 = vadd.f32 %v3651_v58, %v3650_v1 }
 0x33b   :  { %v3715_v8 = vpop.f32.mrb[131].mxu0 }
 0x33c   :  { %v3716_v50 = vadd.f32 %v3715_v8, %v3714_v46  ;;  %v2633_v60 = vadd.f32 %v3652_v54, %v4918_v14  ;;  %v4958_v11 = vadd.f32 %v3713_v40, %v2630_v18 }
 0x33e   :  { %v3653_v48 = vpop.f32.mrb[116].mxu1  ;;  %v4960_v49 = vadd.f32 %v3716_v50, %v2633_v60 }
 0x33f   :  { %v3654_v22 = vpop.f32.mrb[117].mxu1 }
 0x340   :  { %v3717_v36 = vpop.f32.mrb[132].mxu0  ;;  %v3655_v32 = vadd.f32 %v3654_v22, %v3653_v48  ;;  %v3656_v59 = vpop.f32.mrb[118].mxu1 }
 0x341   :  { %v3718_v35 = vpop.f32.mrb[133].mxu0  ;;  %v3657_v25 = vpop.f32.mrb[119].mxu1 }
 0x342   :  { %v3719_v45 = vadd.f32 %v3718_v35, %v3717_v36  ;;  %v3720_v12 = vpop.f32.mrb[134].mxu0  ;;  %v2638_v30 = vadd.f32 %v3655_v32, %v4920_v3  ;;  %v3658_v21 = vadd.f32 %v3657_v25, %v3656_v59 }
 0x343   :  { %v3721_v7 = vpop.f32.mrb[135].mxu0 }
 0x344   :  { %v3722_v56 = vadd.f32 %v3721_v7, %v3720_v12  ;;  %v2641_v14 = vadd.f32 %v3658_v21, %v4922_v47  ;;  %v4964_v57 = vadd.f32 %v3719_v45, %v2638_v30 }
 0x346   :  { %v3659_v20 = vpop.f32.mrb[120].mxu1  ;;  %v4966_v28 = vadd.f32 %v3722_v56, %v2641_v14 }
 0x347   :  { %v3660_v37 = vpop.f32.mrb[121].mxu1 }
 0x348   :  { %v3723_v44 = vpop.f32.mrb[136].mxu0  ;;  %v3661_v0 = vadd.f32 %v3660_v37, %v3659_v20  ;;  %v3662_v9 = vpop.f32.mrb[122].mxu1 }
 0x349   :  { %v3724_v26 = vpop.f32.mrb[137].mxu0  ;;  %v3663_v2 = vpop.f32.mrb[123].mxu1 }
 0x34a   :  { %v3725_v13 = vadd.f32 %v3724_v26, %v3723_v44  ;;  %v3726_v6 = vpop.f32.mrb[138].mxu0  ;;  %v2646_v3 = vadd.f32 %v3661_v0, %v4924_v52  ;;  %v3664_v39 = vadd.f32 %v3663_v2, %v3662_v9 }
 0x34b   :  { %v3727_v51 = vpop.f32.mrb[139].mxu0 }
 0x34c   :  { %v3728_v5 = vadd.f32 %v3727_v51, %v3726_v6  ;;  %v2649_v47 = vadd.f32 %v3664_v39, %v4926_v38  ;;  %v4970_v4 = vadd.f32 %v3725_v13, %v2646_v3 }
 0x34e   :  { %v3665_v15 = vpop.f32.mrb[124].mxu1  ;;  %v4972_v27 = vadd.f32 %v3728_v5, %v2649_v47 }
 0x34f   :  { %v3666_v43 = vpop.f32.mrb[125].mxu1 }
 0x350   :  { %v3729_v41 = vpop.f32.mrb[140].mxu0  ;;  %v3667_v63 = vadd.f32 %v3666_v43, %v3665_v15  ;;  %v3668_v10 = vpop.f32.mrb[126].mxu1 }
 0x351   :  { %v3730_v55 = vpop.f32.mrb[141].mxu0  ;;  %v3669_v40 = vpop.f32.mrb[127].mxu1 }
 0x352   :  { %v3731_v61 = vadd.f32 %v3730_v55, %v3729_v41  ;;  %v3732_v1 = vpop.f32.mrb[142].mxu0  ;;  %v2654_v52 = vadd.f32 %v3667_v63, %v4928_v17  ;;  %v3670_v46 = vadd.f32 %v3669_v40, %v3668_v10 }
 0x353   :  { %v3733_v58 = vpop.f32.mrb[143].mxu0 }
 0x354   :  { %v3734_v18 = vadd.f32 %v3733_v58, %v3732_v1  ;;  %v2657_v38 = vadd.f32 %v3670_v46, %v4930_v23  ;;  %v2751_v54 = vadd.f32 %v3731_v61, %v2654_v52 }
 0x356   :  { %v3801_v8 = vpop.f32.mrb[128].mxu1  ;;  %v2754_v50 = vadd.f32 %v3734_v18, %v2657_v38 }
 0x357   :  { %v4977_v60 = vadd.f32 %v3801_v8, %v4940_v33  ;;  %v2791_v48 = vpop.f32.mrb[129].mxu1 }
 0x358   :  { %v4980_v36 = vadd.f32 %v2791_v48, %v4934_v16  ;;  %v3802_v22 = vpop.f32.mrb[130].mxu1 }
 0x359   :  { %v4983_v32 = vadd.f32 %v3802_v22, %v4942_v34  ;;  %v2794_v17 = vpop.f32.mrb[131].mxu1  ;;  %v2877_v16 = vmul.f32 %v4977_v60, %v4977_v60 }
 0x35a   :  { %v4986_v35 = vadd.f32 %v2794_v17, %v4936_v29  ;;  %v2875_v23 = vmul.f32 %v4980_v36, %v4980_v36 }
 0x35b   :  { %v2878_v30 = vmul.f32 %v4983_v32, %v4983_v32 }
 0x35c   :  { %v2854_v59 = vadd.f32 %v4986_v35, %v4980_v36  ;;  %v2876_v33 = vmul.f32 %v4986_v35, %v4986_v35 }
 0x35e   :  { %v2855_v45 = vadd.f32 %v2854_v59, %v4977_v60  ;;  %v2891_v34 = vadd.f32 %v2876_v33, %v2875_v23  ;;  %v3805_v12 = vpop.f32.mrb[132].mxu1 }
 0x35f   :  { %v4998_v25 = vadd.f32 %v3805_v12, %v4952_v19  ;;  %v2807_v29 = vpop.f32.mrb[133].mxu1 }
 0x360   :  { %v2892_v21 = vadd.f32 %v2891_v34, %v2877_v16  ;;  %v5003_v7 = vadd.f32 %v2807_v29, %v4946_v31  ;;  %v2856_v56 = vadd.f32 %v2855_v45, %v4983_v32  ;;  %v3806_v14 = vpop.f32.mrb[134].mxu1 }
 0x361   :  { %v5007_v20 = vadd.f32 %v3806_v14, %v4954_v24  ;;  %v2810_v44 = vpop.f32.mrb[135].mxu1  ;;  %v2881_v24 = vmul.f32 %v4998_v25, %v4998_v25 }
 0x362   :  { %v2857_v37 = vadd.f32 %v2856_v56, %v5003_v7  ;;  %v2879_v19 = vmul.f32 %v5003_v7, %v5003_v7  ;;  %v2893_v0 = vadd.f32 %v2892_v21, %v2878_v30  ;;  %v5013_v26 = vadd.f32 %v2810_v44, %v4948_v62 }
 0x363   :  { %v2882_v62 = vmul.f32 %v5007_v20, %v5007_v20 }
 0x364   :  { %v2894_v9 = vadd.f32 %v2893_v0, %v2879_v19  ;;  %v2858_v31 = vadd.f32 %v2857_v37, %v5013_v26  ;;  %v2880_v13 = vmul.f32 %v5013_v26, %v5013_v26 }
 0x366   :  { %v2859_v6 = vadd.f32 %v2858_v31, %v4998_v25  ;;  %v2895_v2 = vadd.f32 %v2894_v9, %v2880_v13  ;;  %v3809_v3 = vpop.f32.mrb[136].mxu1 }
 0x367   :  { %v5022_v39 = vadd.f32 %v3809_v3, %v4964_v57  ;;  %v2823_v51 = vpop.f32.mrb[137].mxu1 }
 0x368   :  { %v2896_v5 = vadd.f32 %v2895_v2, %v2881_v24  ;;  %v5027_v47 = vadd.f32 %v2823_v51, %v4958_v11  ;;  %v2860_v15 = vadd.f32 %v2859_v6, %v5007_v20  ;;  %v3810_v41 = vpop.f32.mrb[138].mxu1 }
 0x369   :  { %v5031_v43 = vadd.f32 %v3810_v41, %v4966_v28  ;;  %v2826_v63 = vpop.f32.mrb[139].mxu1  ;;  %v2885_v28 = vmul.f32 %v5022_v39, %v5022_v39 }
 0x36a   :  { %v2861_v55 = vadd.f32 %v2860_v15, %v5027_v47  ;;  %v2883_v57 = vmul.f32 %v5027_v47, %v5027_v47  ;;  %v2897_v10 = vadd.f32 %v2896_v5, %v2882_v62  ;;  %v5037_v61 = vadd.f32 %v2826_v63, %v4960_v49 }
 0x36b   :  { %v2886_v49 = vmul.f32 %v5031_v43, %v5031_v43 }
 0x36c   :  { %v2898_v1 = vadd.f32 %v2897_v10, %v2883_v57  ;;  %v2862_v11 = vadd.f32 %v2861_v55, %v5037_v61  ;;  %v2884_v40 = vmul.f32 %v5037_v61, %v5037_v61 }
 0x36e   :  { %v2863_v52 = vadd.f32 %v2862_v11, %v5022_v39  ;;  %v2899_v46 = vadd.f32 %v2898_v1, %v2884_v40  ;;  %v3813_v58 = vpop.f32.mrb[140].mxu1 }
 0x36f   :  { %v5045_v18 = vadd.f32 %v3813_v58, %v2751_v54  ;;  %v2839_v38 = vpop.f32.mrb[141].mxu1 }
 0x370   :  { %v2900_v8 = vadd.f32 %v2899_v46, %v2885_v28  ;;  %v5050_v48 = vadd.f32 %v2839_v38, %v4970_v4  ;;  %v2864_v22 = vadd.f32 %v2863_v52, %v5031_v43  ;;  %v3814_v17 = vpop.f32.mrb[142].mxu1 }
 0x371   :  { %v5053_v23 = vadd.f32 %v3814_v17, %v2754_v50  ;;  %v2842_v59 = vpop.f32.mrb[143].mxu1  ;;  %v2889_v4 = vmul.f32 %v5045_v18, %v5045_v18 }
 0x372   :  { %v2865_v33 = vadd.f32 %v2864_v22, %v5050_v48  ;;  %v2887_v54 = vmul.f32 %v5050_v48, %v5050_v48  ;;  %v2901_v16 = vadd.f32 %v2900_v8, %v2886_v49  ;;  %v2843_v45 = vadd.f32 %v2842_v59, %v4972_v27  ;;  %v2992_v8 = vld [vmem:[#allocation3 + $0x68] sm:$0xff] }
 0x373   :  { %v2890_v50 = vmul.f32 %v5053_v23, %v5053_v23 }
 0x374   :  { %v2902_v34 = vadd.f32 %v2901_v16, %v2887_v54  ;;  %v2866_v12 = vadd.f32 %v2865_v33, %v2843_v45  ;;  %v2888_v29 = vmul.f32 %v2843_v45, %v2843_v45 }
 0x376   :  { %v2867_v30 = vadd.f32 %v2866_v12, %v5045_v18  ;;  %v2903_v21 = vadd.f32 %v2902_v34, %v2888_v29 }
 0x378   :  { %v2868_v56 = vadd.f32 %v2867_v30, %v5053_v23  ;;  %v2904_v14 = vadd.f32 %v2903_v21, %v2889_v4  ;;  %v2979_v21 = vld [vmem:[#allocation3] sm:$0xff] }
 0x37a   :  { %v2869_v44 = vrot.slane %v2868_v56, 4  ;;  %v2905_v37 = vadd.f32 %v2904_v14, %v2890_v50  ;;  %v2980_v50 = vld [vmem:[#allocation3 + $0x8] sm:$0xff] }
 0x37c   :  { %v2870_v19 = vadd.f32 %v2869_v44, %v2868_v56  ;;  %v2906_v0 = vrot.slane %v2905_v37, 4 }
 0x37e   :  { %v2871_v27 = vrot.slane %v2870_v19, 2  ;;  %v2907_v9 = vadd.f32 %v2906_v0, %v2905_v37  ;;  %v2982_v0 = vld [vmem:[#allocation3 + $0x18] sm:$0xff] }
 0x380   :  { %v2872_v31 = vadd.f32 %v2871_v27, %v2870_v19  ;;  %v2908_v13 = vrot.slane %v2907_v9, 2  ;;  %v2981_v19 = vld [vmem:[#allocation3 + $0x10] sm:$0xff]  ;;  %v2983_v27 = vld [vmem:[#allocation3 + $0x20] sm:$0xff] }
 0x382   :  { %v2873_v24 = vrot.slane %v2872_v31, 1  ;;  %v2909_v6 = vadd.f32 %v2908_v13, %v2907_v9 }
 0x384   :  { %v2874_v2 = vadd.f32 %v2873_v24, %v2872_v31  ;;  %v2910_v3 = vrot.slane %v2909_v6, 1 }
 0x386   :  { %v2911_v51 = vadd.f32 %v2910_v3, %v2909_v6  ;;  %v2912_v62 = vmul.f32 0.0078125, %v2874_v2  ;;  %v2984_v6 = vld [vmem:[#allocation3 + $0x28] sm:$0xff]  ;;  %v2985_v2 = vld [vmem:[#allocation3 + $0x30] sm:$0xff]  ;;  %v2986_v3 = vld [vmem:[#allocation3 + $0x38] sm:$0xff] }
 0x388   :  { %v2913_v5 = vmul.f32 0.0078125, %v2911_v51  ;;  %v2914_v15 = vmul.f32 %v2912_v62, %v2912_v62  ;;  %v2933_v41 = vsub.f32 %v2843_v45, %v2912_v62  ;;  %v2920_v63 = vsub.f32 %v4980_v36, %v2912_v62 }
 0x389   :  { %v2921_v55 = vsub.f32 %v4986_v35, %v2912_v62  ;;  %v2922_v57 = vsub.f32 %v4977_v60, %v2912_v62  ;;  %v2923_v10 = vsub.f32 %v4983_v32, %v2912_v62  ;;  %v2924_v1 = vsub.f32 %v5003_v7, %v2912_v62 }
 0x38a   :  { %v2915_v11 = vsub.f32 %v2913_v5, %v2914_v15  ;;  %v2925_v40 = vsub.f32 %v5013_v26, %v2912_v62  ;;  %v2926_v28 = vsub.f32 %v4998_v25, %v2912_v62  ;;  %v2927_v52 = vsub.f32 %v5007_v20, %v2912_v62  ;;  %v2918_v25 = vld [vmem:[%s5108_s5] sm:$0x1]  ;;  %s4076_s5 = smov [#allocation9]  }
 0x38b   :  { %v2928_v46 = vsub.f32 %v5027_v47, %v2912_v62  ;;  %v2929_v58 = vsub.f32 %v5037_v61, %v2912_v62  ;;  %v2930_v36 = vsub.f32 %v5022_v39, %v2912_v62  ;;  %v2931_v35 = vsub.f32 %v5031_v43, %v2912_v62  ;;  %v3206_v39 = vld [vmem:[%s5109_s6] ss:$0 sm:$0xff]  ;;  %s3048_s6 = sshll.u32 %s4076_s5, 4  ;;  %s3049_s6 = int_to_ptr.vmem [resolvable:$true] %s3048_s6 }
 0x38c   :  { %v2916_v60 = vadd.f32 1e-05, %v2915_v11  ;;  %v2932_v32 = vsub.f32 %v5050_v48, %v2912_v62  ;;  %v2934_v7 = vsub.f32 %v5045_v18, %v2912_v62  ;;  %v2935_v38 = vsub.f32 %v5053_v23, %v2912_v62  ;;  %v2991_v11 = vld [vmem:[#allocation3 + $0x60] sm:$0xff]  ;;  %s4040_s21 = scalar_lea.vmem %s3049_s6, 2048  ;;  %p4045_p11 = scmp.lt.s32.totalorder %s3049_s6, %s3049_s6 }
 0x38d   :  { %p4041_p10 = scmp.ne.s32.totalorder %s3049_s6, %s4040_s21  ;;  %p4046_p12 = scmp.lt.s32.totalorder %s4040_s21, %s4040_s21 }
 0x38e   :  { %3970 = vrsqrt.f32 %v2916_v60 }
 0x38f   :  { %p4047_p13 = por %p4046_p12, %p4045_p11 }
 0x391   :  { %p4048_p0 = pnand %p4047_p13, %p4041_p10 }
 0x398   :  { %v3971_v20 = vpop.eup %3970 }
 0x399   :  { %v2919_v26 = vmul.f32 %v3971_v20, %v2918_v25 }
 0x39b   :  { %v2939_v47 = vrot.slane %v2919_v26, %v1504_v53 }
 0x39d   :  { %v2953_v43 = vmul.f32 %v2939_v47, %v2933_v41  ;;  %v2940_v61 = vmul.f32 %v2939_v47, %v2920_v63  ;;  %v2941_v49 = vmul.f32 %v2939_v47, %v2921_v55  ;;  %v2942_v18 = vmul.f32 %v2939_v47, %v2922_v57  ;;  %v2987_v41 = vld [vmem:[#allocation3 + $0x40] sm:$0xff]  ;;  %v2988_v63 = vld [vmem:[#allocation3 + $0x48] sm:$0xff]  ;;  %v2989_v55 = vld [vmem:[#allocation3 + $0x50] sm:$0xff] }
 0x39e   :  { %v2943_v48 = vmul.f32 %v2939_v47, %v2923_v10  ;;  %v2944_v22 = vmul.f32 %v2939_v47, %v2924_v1  ;;  %v2945_v17 = vmul.f32 %v2939_v47, %v2925_v40  ;;  %v2946_v23 = vmul.f32 %v2939_v47, %v2926_v28  ;;  %v2990_v1 = vld [vmem:[#allocation3 + $0x58] sm:$0xff]  ;;  %v2993_v40 = vld [vmem:[#allocation3 + $0x70] sm:$0xff] }
 0x39f   :  { %v2976_v59 = vadd.f32 %v3206_v39, %v2953_v43  ;;  %v2947_v33 = vmul.f32 %v2939_v47, %v2927_v52  ;;  %v2948_v54 = vmul.f32 %v2939_v47, %v2928_v46  ;;  %v2949_v16 = vmul.f32 %v2939_v47, %v2929_v58  ;;  %v2994_v46 = vld [vmem:[#allocation3 + $0x78] sm:$0xff] }
 0x3a0   :  { %v2950_v45 = vmul.f32 %v2939_v47, %v2930_v36  ;;  %v2951_v42 = vmul.f32 %v2939_v47, %v2931_v35  ;;  %v2952_v53 = vmul.f32 %v2939_v47, %v2932_v32  ;;  %v2954_v34 = vmul.f32 %v2939_v47, %v2934_v7 }
 0x3a1   :  { %v3008_v12 = vadd.f32 %v2992_v8, %v2976_v59  ;;  %v2955_v29 = vmul.f32 %v2939_v47, %v2935_v38  ;;  %v2963_v4 = vadd.f32 %v3206_v39, %v2940_v61  ;;  %v2964_v30 = vadd.f32 %v3206_v39, %v2941_v49 }
 0x3a2   :  { %v2965_v56 = vadd.f32 %v3206_v39, %v2942_v18  ;;  %v2966_v14 = vadd.f32 %v3206_v39, %v2943_v48  ;;  %v2967_v44 = vadd.f32 %v3206_v39, %v2944_v22  ;;  %v2968_v37 = vadd.f32 %v3206_v39, %v2945_v17 }
 0x3a3   :  { %v3024_v9 = vmax.f32 %v3008_v12, 0.0  ;;  %v2969_v31 = vadd.f32 %v3206_v39, %v2946_v23  ;;  %v2970_v13 = vadd.f32 %v3206_v39, %v2947_v33  ;;  %v2971_v24 = vadd.f32 %v3206_v39, %v2948_v54 }
 0x3a4   :  { %v2972_v51 = vadd.f32 %v3206_v39, %v2949_v16  ;;  %v2973_v62 = vadd.f32 %v3206_v39, %v2950_v45  ;;  %v2974_v5 = vadd.f32 %v3206_v39, %v2951_v42  ;;  %v2975_v15 = vadd.f32 %v3206_v39, %v2952_v53 }
 0x3a5   :  { %3040 = vst [vmem:[#allocation9 + $0x68] sm:$0xff] %v3024_v9  ;;  %v2977_v57 = vadd.f32 %v3206_v39, %v2954_v34  ;;  %v2978_v10 = vadd.f32 %v3206_v39, %v2955_v29  ;;  %v2995_v28 = vadd.f32 %v2979_v21, %v2963_v4  ;;  %v2996_v52 = vadd.f32 %v2980_v50, %v2964_v30 }
 0x3a6   :  { %v2997_v58 = vadd.f32 %v2981_v19, %v2965_v56  ;;  %v2998_v36 = vadd.f32 %v2982_v0, %v2966_v14  ;;  %v2999_v35 = vadd.f32 %v2983_v27, %v2967_v44  ;;  %v3000_v60 = vadd.f32 %v2984_v6, %v2968_v37 }
 0x3a7   :  { %v3001_v32 = vadd.f32 %v2985_v2, %v2969_v31  ;;  %v3002_v7 = vadd.f32 %v2986_v3, %v2970_v13  ;;  %v3003_v38 = vadd.f32 %v2987_v41, %v2971_v24  ;;  %v3004_v25 = vadd.f32 %v2988_v63, %v2972_v51 }
 0x3a8   :  { %v3005_v20 = vadd.f32 %v2989_v55, %v2973_v62  ;;  %v3006_v26 = vadd.f32 %v2990_v1, %v2974_v5  ;;  %v3007_v47 = vadd.f32 %v2991_v11, %v2975_v15  ;;  %v3009_v43 = vadd.f32 %v2993_v40, %v2977_v57 }
 0x3a9   :  { %v3010_v61 = vadd.f32 %v2994_v46, %v2978_v10  ;;  %v3011_v39 = vmax.f32 %v2995_v28, 0.0  ;;  %v3012_v49 = vmax.f32 %v2996_v52, 0.0  ;;  %v3013_v18 = vmax.f32 %v2997_v58, 0.0 }
 0x3aa   :  { %v3014_v8 = vmax.f32 %v2998_v36, 0.0  ;;  %v3015_v48 = vmax.f32 %v2999_v35, 0.0  ;;  %v3016_v22 = vmax.f32 %v3000_v60, 0.0  ;;  %v3017_v17 = vmax.f32 %v3001_v32, 0.0 }
 0x3ab   :  { %v3018_v23 = vmax.f32 %v3002_v7, 0.0  ;;  %v3019_v59 = vmax.f32 %v3003_v38, 0.0  ;;  %v3020_v33 = vmax.f32 %v3004_v25, 0.0  ;;  %v3021_v54 = vmax.f32 %v3005_v20, 0.0  ;;  %3027 = vst [vmem:[#allocation9] sm:$0xff] %v3011_v39  ;;  %3028 = vst [vmem:[#allocation9 + $0x8] sm:$0xff] %v3012_v49 }
 0x3ac   :  { %3029 = vst [vmem:[#allocation9 + $0x10] sm:$0xff] %v3013_v18  ;;  %v3022_v16 = vmax.f32 %v3006_v26, 0.0  ;;  %v3023_v45 = vmax.f32 %v3007_v47, 0.0  ;;  %v3025_v42 = vmax.f32 %v3009_v43, 0.0  ;;  %v3026_v53 = vmax.f32 %v3010_v61, 0.0  ;;  %3030 = vst [vmem:[#allocation9 + $0x18] sm:$0xff] %v3014_v8 }
 0x3ad   :  { %3031 = vst [vmem:[#allocation9 + $0x20] sm:$0xff] %v3015_v48  ;;  %3032 = vst [vmem:[#allocation9 + $0x28] sm:$0xff] %v3016_v22 }
 0x3ae   :  { %3033 = vst [vmem:[#allocation9 + $0x30] sm:$0xff] %v3017_v17  ;;  %3034 = vst [vmem:[#allocation9 + $0x38] sm:$0xff] %v3018_v23 }
 0x3af   :  { %3035 = vst [vmem:[#allocation9 + $0x40] sm:$0xff] %v3019_v59  ;;  %3036 = vst [vmem:[#allocation9 + $0x48] sm:$0xff] %v3020_v33 }
 0x3b0   :  { %3037 = vst [vmem:[#allocation9 + $0x50] sm:$0xff] %v3021_v54  ;;  %3038 = vst [vmem:[#allocation9 + $0x58] sm:$0xff] %v3022_v16 }
 0x3b1   :  { %3039 = vst [vmem:[#allocation9 + $0x60] sm:$0xff] %v3023_v45  ;;  %3041 = vst [vmem:[#allocation9 + $0x70] sm:$0xff] %v3025_v42 }
 0x3b2   :  { %3042 = vst [vmem:[#allocation9 + $0x78] sm:$0xff] %v3026_v53 }
 0x3b3   :  { %4051 = shalt.err (!%p4048_p0)
}
 0x3b4   :  { %s4052_s24 = scalar_lea.hbm %s5110_s7, 2048 }
 0x3b5   :  { %p4053_p1 = scmp.ne.s32.totalorder %s5110_s7, %s4052_s24  ;;  %p4056_p2 = scmp.lt.u32.totalorder %s4052_s24, %s5110_s7 }
 0x3b7   :  { %p4058_p3 = pnand %p4056_p2, %p4053_p1 }
 0x3b9   :  { %4061 = shalt.err (!%p4058_p3)
}
 0x3ba   :  { %3054 = dma.vmem_to_hbm [thread:$0]  %s3049_s6, 2048, %s5110_s7, [#allocation5], %s4072_s1, %s4072_s1, %s4073_s25  }
 0x3bb   :  { %4066 = dma.done.wait [#allocation5], 2048  }
 0x3bc   :  { %4067 = vsyncadd [#allocation5], 4294965248 }
 0x3bd   :  { %3058 = vsyncpa [#allocation4], 1 }
 0x3be   :  { %3059 = vsyncpa [#allocation7], 1 }
 0x3bf   :  { %3060 = vsyncpa [#allocation5], 1 }

</bundles_post_ra>
